<compile_context>
chip_gen: v7x
topology: tpu7x:2x2x1
jax: 0.10.0
libtpu: 0.0.40
codegen_flags: <defaults>
</compile_context>

<pallas_src>
import jax
import jax.numpy as jnp
from jax.experimental import pallas as pl
from jax.experimental.pallas import tpu as pltpu

# ------------------------------ dimensions ---------------------------------
B, C_IN, H, W = 2, 4, 16, 16          # input pixel_values [B, C, H, W]
PATCH = 4
T = (H // PATCH) * (W // PATCH)       # 16 tokens / image == num_queries
P = C_IN * PATCH * PATCH              # 64  patch dim
D = 64                                # hidden dim
E = 4                                 # number of experts
F = 128                               # expert FFN dim
NUM_CLASSES = 8                       # detection classes
BOX_DIM = 6                           # raw box head dim (wrapper fixes -> 4)
HEAD_DIM = NUM_CLASSES + BOX_DIM      # merged head output width
N_TOK = B * T                         # all tokens processed in one block


# ------------------------------ Pallas kernel -------------------------------
def moe_det_kernel(patches_ref,
                   w_emb_ref, b_emb_ref,
                   w_rt_ref, b_rt_ref,
                   w1s_ref, b1s_ref, w2s_ref, b2_ref,
                   w_head_ref, b_head_ref,
                   out_ref):
    # patch embedding: [N, P](bf16) @ [P, D](bf16) -> f32 accumulate
    x = jnp.dot(patches_ref[...], w_emb_ref[...],
                preferred_element_type=jnp.float32) + b_emb_ref[...]
    x_bf = x.astype(jnp.bfloat16)

    # router: softmax over experts (f32 elementwise, recip on EUP)
    r_logits = jnp.dot(x_bf, w_rt_ref[...],
                       preferred_element_type=jnp.float32) + b_rt_ref[...]
    r_max = jnp.max(r_logits, axis=-1, keepdims=True)
    r_exp = jnp.exp(r_logits - r_max)
    r = r_exp * pl.reciprocal(jnp.sum(r_exp, axis=-1, keepdims=True),
                              approx=True)                     # [N, E]
    g_max = jnp.max(r, axis=-1, keepdims=True)                 # [N, 1]

    # top-1 gate per expert (first-max tie break == argmax); pure VPU
    gate_cols = []
    remaining = jnp.ones((N_TOK, 1), jnp.float32)
    for e in range(E):
        re = r[:, e:e + 1]                                      # [N, 1]
        is_top = jnp.where((re >= g_max) & (remaining > 0.0), 1.0, 0.0)
        remaining = remaining - is_top
        gate_cols.append(is_top * re)

    # stacked experts: one [N,D]@[D,E*F] and one [N,E*F]@[E*F,D] matmul
    h_all = jnp.dot(x_bf, w1s_ref[...],
                    preferred_element_type=jnp.float32) + b1s_ref[...]
    # TODO(synk): torch nn.GELU default is exact erf; tanh-approx used here for
    # a guaranteed EUP-friendly Mosaic lowering (exp/tanh), tiny numeric delta.
    h_all = jax.nn.gelu(h_all)                                  # [N, E*F]

    # fold the gate into h (VPU scale per lane-aligned F-slice), then one matmul
    scaled = jnp.concatenate(
        [h_all[:, e * F:(e + 1) * F] * gate_cols[e] for e in range(E)],
        axis=-1)                                                # [N, E*F]
    moe = jnp.dot(scaled.astype(jnp.bfloat16), w2s_ref[...],
                  preferred_element_type=jnp.float32)           # [N, D]
    # gate-weighted expert biases (outside the matmul, so results match loop form)
    for e in range(E):
        moe = moe + gate_cols[e] * b2_ref[e:e + 1, :]

    y = x + moe                                                 # residual

    # merged detection head: one [N,D]@[D,14] matmul, single lane store
    head = jnp.dot(y.astype(jnp.bfloat16), w_head_ref[...],
                   preferred_element_type=jnp.float32) + b_head_ref[...]
    col = jax.lax.broadcasted_iota(jnp.int32, head.shape, 1)
    out_ref[...] = jnp.where(col < NUM_CLASSES, head, jax.nn.sigmoid(head))


# ------------------------------ pallas_call wrapper --------------------------
def _full_spec(shape):
    """Whole-array block, same tile for every grid step."""
    nd = len(shape)
    return pl.BlockSpec(shape, lambda i, _nd=nd: (0,) * _nd)


def _moe_forward_core(pixel_values, params):
    """Synthetic `moe_model(pixel_values)` hot path on TPU via Pallas."""
    # --- glue: NCHW -> patch tokens [B*T, P] (bf16 for the MXU) ---
    x = pixel_values.reshape(B, C_IN, H // PATCH, PATCH, W // PATCH, PATCH)
    x = jnp.transpose(x, (0, 2, 4, 1, 3, 5))            # [B, Hp, Wp, C, p, p]
    patches = x.reshape(N_TOK, P).astype(jnp.bfloat16)

    (w_emb, b_emb, w_rt, b_rt, w1, b1, w2, b2,
     w_cls, b_cls, w_box, b_box) = params

    # --- stack expert weights / merge heads (inside jit; fused by XLA) ---
    w1_s = jnp.transpose(w1, (1, 0, 2)).reshape(D, E * F).astype(jnp.bfloat16)
    b1_s = b1.reshape(1, E * F).astype(jnp.float32)
    w2_s = w2.reshape(E * F, D).astype(jnp.bfloat16)
    b2_s = b2.reshape(E, D).astype(jnp.float32)
    w_head = jnp.concatenate([w_cls, w_box], axis=1).astype(jnp.bfloat16)
    b_head = jnp.concatenate([b_cls, b_box], axis=1).astype(jnp.float32)
    w_emb_b = w_emb.astype(jnp.bfloat16)
    w_rt_b = w_rt.astype(jnp.bfloat16)

    inputs = (patches, w_emb_b, b_emb, w_rt_b, b_rt,
              w1_s, b1_s, w2_s, b2_s, w_head, b_head)

    grid_spec = pltpu.PrefetchScalarGridSpec(
        num_scalar_prefetch=0,
        grid=(1,),
        in_specs=[_full_spec(a.shape) for a in inputs],
        out_specs=pl.BlockSpec((N_TOK, HEAD_DIM), lambda i: (0, 0)),
    )

    # advisory cost hint (kernel is tiny; keep XLA from serializing around it)
    mm = P * D + D * E + D * (E * F) + (E * F) * D + D * HEAD_DIM
    cost = pl.CostEstimate(
        flops=2 * N_TOK * mm,
        transcendentals=N_TOK * (E * F + E + BOX_DIM + 2),
        bytes_accessed=2 * mm + 4 * (D + E + E * F + E * D + HEAD_DIM)
        + 2 * N_TOK * P + 4 * N_TOK * HEAD_DIM,
    )

    head_out = pl.pallas_call(
        moe_det_kernel,
        out_shape=jax.ShapeDtypeStruct((N_TOK, HEAD_DIM), jnp.float32),
        grid_spec=grid_spec,
        cost_estimate=cost,
        compiler_params=pltpu.CompilerParams(
            dimension_semantics=("arbitrary",)),
    )(*inputs)

    head_out = head_out.reshape(B, T, HEAD_DIM)
    logits = head_out[..., :NUM_CLASSES]
    pred_boxes = head_out[..., NUM_CLASSES:]        # [B, T, BOX_DIM]
    return logits, pred_boxes


# ---------------- ValidatedMoEObjectDetectionModel.forward -------------------
@jax.jit
def _validated_forward_jit(pixel_values, params):
    logits, pred_boxes = _moe_forward_core(pixel_values, params)

    # moe_output.loss = torch.tensor(0.0, ...)
    loss = jnp.array(0.0, dtype=jnp.float32)

    # fix pred_boxes last dim to 4 (slice or zero-pad) — static shape check
    if pred_boxes.shape[-1] != 4:
        if pred_boxes.shape[-1] > 4:
            pred_boxes = pred_boxes[..., :4]
        else:
            batch_size, num_queries = pred_boxes.shape[:2]
            padding_size = 4 - pred_boxes.shape[-1]
            padding = jnp.zeros((batch_size, num_queries, padding_size),
                                dtype=pred_boxes.dtype)
            pred_boxes = jnp.concatenate([pred_boxes, padding], axis=-1)

    # .contiguous() is a no-op for JAX arrays
    return {"loss": loss, "logits": logits, "pred_boxes": pred_boxes}


def validated_forward(pixel_values, params, labels=None):
    # `labels` only fed the (discarded) loss in the reference; wrapper forces 0.0
    return _validated_forward_jit(pixel_values, params)


# ------------------------------ parameter init -------------------------------
def init_params(key):
    ks = jax.random.split(key, 12)
    s = 0.02
    w_emb = jax.random.normal(ks[0], (P, D), jnp.float32) * s
    b_emb = jnp.zeros((1, D), jnp.float32)
    w_rt = jax.random.normal(ks[1], (D, E), jnp.float32) * s
    b_rt = jnp.zeros((1, E), jnp.float32)
    w1 = jax.random.normal(ks[2], (E, D, F), jnp.float32) * s
    b1 = jnp.zeros((E, 1, F), jnp.float32)
    w2 = jax.random.normal(ks[3], (E, F, D), jnp.float32) * s
    b2 = jnp.zeros((E, 1, D), jnp.float32)
    w_cls = jax.random.normal(ks[4], (D, NUM_CLASSES), jnp.float32) * s
    b_cls = jnp.zeros((1, NUM_CLASSES), jnp.float32)
    w_box = jax.random.normal(ks[5], (D, BOX_DIM), jnp.float32) * s
    b_box = jnp.zeros((1, BOX_DIM), jnp.float32)
    return (w_emb, b_emb, w_rt, b_rt, w1, b1, w2, b2,
            w_cls, b_cls, w_box, b_box)


# ------------------------------ main -----------------------------------------
if __name__ == "__main__":
    key = jax.random.PRNGKey(0)
    k_in, k_par = jax.random.split(key)

    pixel_values = jax.random.normal(k_in, (B, C_IN, H, W), jnp.float32)
    params = init_params(k_par)

    out = validated_forward(pixel_values, params)
    out = jax.tree_util.tree_map(jax.block_until_ready, out)

    assert out["logits"].shape == (B, T, NUM_CLASSES)
    assert out["pred_boxes"].shape == (B, T, 4)
    assert float(out["loss"]) == 0.0
    assert bool(jnp.all(jnp.isfinite(out["logits"])))
    assert bool(jnp.all((out["pred_boxes"] >= 0.0) & (out["pred_boxes"] <= 1.0)))

    print("KERNEL_OK")
</pallas_src>

<mosaic_0001>
module attributes {stable_mosaic.version = 11 : i64} {
  func.func @moe_det_kernel(%arg0: i32, %arg1: memref<32x64xbf16, #tpu.memory_space<vmem>>, %arg2: memref<64x64xbf16, #tpu.memory_space<vmem>>, %arg3: memref<1x64xf32, #tpu.memory_space<vmem>>, %arg4: memref<64x4xbf16, #tpu.memory_space<vmem>>, %arg5: memref<1x4xf32, #tpu.memory_space<vmem>>, %arg6: memref<64x512xbf16, #tpu.memory_space<vmem>>, %arg7: memref<1x512xf32, #tpu.memory_space<vmem>>, %arg8: memref<512x64xbf16, #tpu.memory_space<vmem>>, %arg9: memref<4x64xf32, #tpu.memory_space<vmem>>, %arg10: memref<64x14xbf16, #tpu.memory_space<vmem>>, %arg11: memref<1x14xf32, #tpu.memory_space<vmem>>, %arg12: memref<32x14xf32, #tpu.memory_space<vmem>>) attributes {dimension_semantics = [#tpu.dimension_semantics<arbitrary>], iteration_bounds = array<i64: 1>, scalar_prefetch = 0 : i64, scratch_operands = 0 : i64, tpu.core_type = #tpu.core_type<tc>, window_params = [{pipeline_mode = #tpu.pipeline_mode<synchronous>, transform_indices = @transform_0, window_bounds = array<i64: 32, 64>}, {pipeline_mode = #tpu.pipeline_mode<synchronous>, transform_indices = @transform_1, window_bounds = array<i64: 64, 64>}, {pipeline_mode = #tpu.pipeline_mode<synchronous>, transform_indices = @transform_2, window_bounds = array<i64: 1, 64>}, {pipeline_mode = #tpu.pipeline_mode<synchronous>, transform_indices = @transform_3, window_bounds = array<i64: 64, 4>}, {pipeline_mode = #tpu.pipeline_mode<synchronous>, transform_indices = @transform_4, window_bounds = array<i64: 1, 4>}, {pipeline_mode = #tpu.pipeline_mode<synchronous>, transform_indices = @transform_5, window_bounds = array<i64: 64, 512>}, {pipeline_mode = #tpu.pipeline_mode<synchronous>, transform_indices = @transform_6, window_bounds = array<i64: 1, 512>}, {pipeline_mode = #tpu.pipeline_mode<synchronous>, transform_indices = @transform_7, window_bounds = array<i64: 512, 64>}, {pipeline_mode = #tpu.pipeline_mode<synchronous>, transform_indices = @transform_8, window_bounds = array<i64: 4, 64>}, {pipeline_mode = #tpu.pipeline_mode<synchronous>, transform_indices = @transform_9, window_bounds = array<i64: 64, 14>}, {pipeline_mode = #tpu.pipeline_mode<synchronous>, transform_indices = @transform_10, window_bounds = array<i64: 1, 14>}, {pipeline_mode = #tpu.pipeline_mode<synchronous>, transform_indices = @transform_11, window_bounds = array<i64: 32, 14>}]} {
    %c0 = arith.constant 0 : index
    %c0_0 = arith.constant 0 : index
    %0 = vector.load %arg1[%c0, %c0_0] : memref<32x64xbf16, #tpu.memory_space<vmem>>, vector<32x64xbf16>
    %c0_1 = arith.constant 0 : index
    %c0_2 = arith.constant 0 : index
    %1 = vector.load %arg2[%c0_1, %c0_2] : memref<64x64xbf16, #tpu.memory_space<vmem>>, vector<64x64xbf16>
    %cst = arith.constant dense<0.000000e+00> : vector<32x64xf32>
    %2 = tpu.matmul %0, %1, %cst {dimension_numbers = #tpu.dot_dimension_numbers<[1], [0], [0], [1], [0, 0, 1, 1], [], []>} : vector<32x64xbf16>, vector<64x64xbf16>, vector<32x64xf32> -> vector<32x64xf32>
    %c0_3 = arith.constant 0 : index
    %c0_4 = arith.constant 0 : index
    %3 = vector.load %arg3[%c0_3, %c0_4] : memref<1x64xf32, #tpu.memory_space<vmem>>, vector<1x64xf32>
    %4 = vector.broadcast %3 : vector<1x64xf32> to vector<32x64xf32>
    %5 = arith.addf %2, %4 : vector<32x64xf32>
    %6 = arith.truncf %5 : vector<32x64xf32> to vector<32x64xbf16>
    %c0_5 = arith.constant 0 : index
    %c0_6 = arith.constant 0 : index
    %7 = vector.load %arg4[%c0_5, %c0_6] : memref<64x4xbf16, #tpu.memory_space<vmem>>, vector<64x4xbf16>
    %cst_7 = arith.constant dense<0.000000e+00> : vector<32x4xf32>
    %8 = tpu.matmul %6, %7, %cst_7 {dimension_numbers = #tpu.dot_dimension_numbers<[1], [0], [0], [1], [0, 0, 1, 1], [], []>} : vector<32x64xbf16>, vector<64x4xbf16>, vector<32x4xf32> -> vector<32x4xf32>
    %c0_8 = arith.constant 0 : index
    %c0_9 = arith.constant 0 : index
    %9 = vector.load %arg5[%c0_8, %c0_9] : memref<1x4xf32, #tpu.memory_space<vmem>>, vector<1x4xf32>
    %10 = vector.broadcast %9 : vector<1x4xf32> to vector<32x4xf32>
    %11 = arith.addf %8, %10 : vector<32x4xf32>
    %cst_10 = arith.constant dense<0xFF800000> : vector<32xf32>
    %12 = vector.multi_reduction <maximumf>, %11, %cst_10 [1] : vector<32x4xf32> to vector<32xf32>
    %13 = vector.shape_cast %12 : vector<32xf32> to vector<32x1xf32>
    %14 = vector.broadcast %13 : vector<32x1xf32> to vector<32x4xf32>
    %15 = arith.subf %11, %14 : vector<32x4xf32>
    %16 = math.exp %15 : vector<32x4xf32>
    %cst_11 = arith.constant dense<0.000000e+00> : vector<32xf32>
    %17 = vector.multi_reduction <add>, %16, %cst_11 [1] : vector<32x4xf32> to vector<32xf32>
    %18 = vector.shape_cast %17 : vector<32xf32> to vector<32x1xf32>
    %19 = tpu.reciprocal %18 {approx = true} : vector<32x1xf32> -> vector<32x1xf32>
    %20 = vector.broadcast %19 : vector<32x1xf32> to vector<32x4xf32>
    %21 = arith.mulf %16, %20 : vector<32x4xf32>
    %cst_12 = arith.constant dense<0xFF800000> : vector<32xf32>
    %22 = vector.multi_reduction <maximumf>, %21, %cst_12 [1] : vector<32x4xf32> to vector<32xf32>
    %23 = vector.shape_cast %22 : vector<32xf32> to vector<32x1xf32>
    %cst_13 = arith.constant 1.000000e+00 : f32
    %24 = vector.broadcast %cst_13 : f32 to vector<32x1xf32>
    %25 = vector.extract_strided_slice %21 {offsets = [0, 0], sizes = [32, 1], strides = [1, 1]} : vector<32x4xf32> to vector<32x1xf32>
    %26 = arith.cmpf oge, %25, %23 : vector<32x1xf32>
    %cst_14 = arith.constant 0.000000e+00 : f32
    %27 = vector.broadcast %cst_14 : f32 to vector<32x1xf32>
    %28 = arith.cmpf ogt, %24, %27 : vector<32x1xf32>
    %29 = arith.andi %26, %28 : vector<32x1xi1>
    %cst_15 = arith.constant 1.000000e+00 : f32
    %cst_16 = arith.constant 0.000000e+00 : f32
    %30 = vector.broadcast %cst_15 : f32 to vector<32x1xf32>
    %31 = vector.broadcast %cst_16 : f32 to vector<32x1xf32>
    %32 = arith.select %29, %30, %31 : vector<32x1xi1>, vector<32x1xf32>
    %33 = arith.subf %24, %32 : vector<32x1xf32>
    %34 = arith.mulf %32, %25 : vector<32x1xf32>
    %35 = vector.extract_strided_slice %21 {offsets = [0, 1], sizes = [32, 1], strides = [1, 1]} : vector<32x4xf32> to vector<32x1xf32>
    %36 = arith.cmpf oge, %35, %23 : vector<32x1xf32>
    %cst_17 = arith.constant 0.000000e+00 : f32
    %37 = vector.broadcast %cst_17 : f32 to vector<32x1xf32>
    %38 = arith.cmpf ogt, %33, %37 : vector<32x1xf32>
    %39 = arith.andi %36, %38 : vector<32x1xi1>
    %cst_18 = arith.constant 1.000000e+00 : f32
    %cst_19 = arith.constant 0.000000e+00 : f32
    %40 = vector.broadcast %cst_18 : f32 to vector<32x1xf32>
    %41 = vector.broadcast %cst_19 : f32 to vector<32x1xf32>
    %42 = arith.select %39, %40, %41 : vector<32x1xi1>, vector<32x1xf32>
    %43 = arith.subf %33, %42 : vector<32x1xf32>
    %44 = arith.mulf %42, %35 : vector<32x1xf32>
    %45 = vector.extract_strided_slice %21 {offsets = [0, 2], sizes = [32, 1], strides = [1, 1]} : vector<32x4xf32> to vector<32x1xf32>
    %46 = arith.cmpf oge, %45, %23 : vector<32x1xf32>
    %cst_20 = arith.constant 0.000000e+00 : f32
    %47 = vector.broadcast %cst_20 : f32 to vector<32x1xf32>
    %48 = arith.cmpf ogt, %43, %47 : vector<32x1xf32>
    %49 = arith.andi %46, %48 : vector<32x1xi1>
    %cst_21 = arith.constant 1.000000e+00 : f32
    %cst_22 = arith.constant 0.000000e+00 : f32
    %50 = vector.broadcast %cst_21 : f32 to vector<32x1xf32>
    %51 = vector.broadcast %cst_22 : f32 to vector<32x1xf32>
    %52 = arith.select %49, %50, %51 : vector<32x1xi1>, vector<32x1xf32>
    %53 = arith.subf %43, %52 : vector<32x1xf32>
    %54 = arith.mulf %52, %45 : vector<32x1xf32>
    %55 = vector.extract_strided_slice %21 {offsets = [0, 3], sizes = [32, 1], strides = [1, 1]} : vector<32x4xf32> to vector<32x1xf32>
    %56 = arith.cmpf oge, %55, %23 : vector<32x1xf32>
    %cst_23 = arith.constant 0.000000e+00 : f32
    %57 = vector.broadcast %cst_23 : f32 to vector<32x1xf32>
    %58 = arith.cmpf ogt, %53, %57 : vector<32x1xf32>
    %59 = arith.andi %56, %58 : vector<32x1xi1>
    %cst_24 = arith.constant 1.000000e+00 : f32
    %cst_25 = arith.constant 0.000000e+00 : f32
    %60 = vector.broadcast %cst_24 : f32 to vector<32x1xf32>
    %61 = vector.broadcast %cst_25 : f32 to vector<32x1xf32>
    %62 = arith.select %59, %60, %61 : vector<32x1xi1>, vector<32x1xf32>
    %63 = arith.mulf %62, %55 : vector<32x1xf32>
    %c0_26 = arith.constant 0 : index
    %c0_27 = arith.constant 0 : index
    %64 = vector.load %arg6[%c0_26, %c0_27] : memref<64x512xbf16, #tpu.memory_space<vmem>>, vector<64x512xbf16>
    %cst_28 = arith.constant dense<0.000000e+00> : vector<32x512xf32>
    %65 = tpu.matmul %6, %64, %cst_28 {dimension_numbers = #tpu.dot_dimension_numbers<[1], [0], [0], [1], [0, 0, 1, 1], [], []>} : vector<32x64xbf16>, vector<64x512xbf16>, vector<32x512xf32> -> vector<32x512xf32>
    %c0_29 = arith.constant 0 : index
    %c0_30 = arith.constant 0 : index
    %66 = vector.load %arg7[%c0_29, %c0_30] : memref<1x512xf32, #tpu.memory_space<vmem>>, vector<1x512xf32>
    %67 = vector.broadcast %66 : vector<1x512xf32> to vector<32x512xf32>
    %68 = arith.addf %65, %67 : vector<32x512xf32>
    %69 = arith.mulf %68, %68 : vector<32x512xf32>
    %70 = arith.mulf %68, %69 : vector<32x512xf32>
    %cst_31 = arith.constant 4.471500e-02 : f32
    %71 = vector.broadcast %cst_31 : f32 to vector<32x512xf32>
    %72 = arith.mulf %71, %70 : vector<32x512xf32>
    %73 = arith.addf %68, %72 : vector<32x512xf32>
    %cst_32 = arith.constant 0.797884583 : f32
    %74 = vector.broadcast %cst_32 : f32 to vector<32x512xf32>
    %75 = arith.mulf %74, %73 : vector<32x512xf32>
    %76 = math.tanh %75 : vector<32x512xf32>
    %cst_33 = arith.constant 1.000000e+00 : f32
    %77 = vector.broadcast %cst_33 : f32 to vector<32x512xf32>
    %78 = arith.addf %77, %76 : vector<32x512xf32>
    %cst_34 = arith.constant 5.000000e-01 : f32
    %79 = vector.broadcast %cst_34 : f32 to vector<32x512xf32>
    %80 = arith.mulf %79, %78 : vector<32x512xf32>
    %81 = arith.mulf %68, %80 : vector<32x512xf32>
    %82 = vector.extract_strided_slice %81 {offsets = [0, 0], sizes = [32, 128], strides = [1, 1]} : vector<32x512xf32> to vector<32x128xf32>
    %83 = vector.broadcast %34 : vector<32x1xf32> to vector<32x128xf32>
    %84 = arith.mulf %82, %83 : vector<32x128xf32>
    %85 = vector.extract_strided_slice %81 {offsets = [0, 128], sizes = [32, 128], strides = [1, 1]} : vector<32x512xf32> to vector<32x128xf32>
    %86 = vector.broadcast %44 : vector<32x1xf32> to vector<32x128xf32>
    %87 = arith.mulf %85, %86 : vector<32x128xf32>
    %88 = vector.extract_strided_slice %81 {offsets = [0, 256], sizes = [32, 128], strides = [1, 1]} : vector<32x512xf32> to vector<32x128xf32>
    %89 = vector.broadcast %54 : vector<32x1xf32> to vector<32x128xf32>
    %90 = arith.mulf %88, %89 : vector<32x128xf32>
    %91 = vector.extract_strided_slice %81 {offsets = [0, 384], sizes = [32, 128], strides = [1, 1]} : vector<32x512xf32> to vector<32x128xf32>
    %92 = vector.broadcast %63 : vector<32x1xf32> to vector<32x128xf32>
    %93 = arith.mulf %91, %92 : vector<32x128xf32>
    %94 = tpu.concatenate %84, %87, %90, %93 in 1 : vector<32x128xf32>, vector<32x128xf32>, vector<32x128xf32>, vector<32x128xf32> -> vector<32x512xf32>
    %95 = arith.truncf %94 : vector<32x512xf32> to vector<32x512xbf16>
    %c0_35 = arith.constant 0 : index
    %c0_36 = arith.constant 0 : index
    %96 = vector.load %arg8[%c0_35, %c0_36] : memref<512x64xbf16, #tpu.memory_space<vmem>>, vector<512x64xbf16>
    %cst_37 = arith.constant dense<0.000000e+00> : vector<32x64xf32>
    %97 = tpu.matmul %95, %96, %cst_37 {dimension_numbers = #tpu.dot_dimension_numbers<[1], [0], [0], [1], [0, 0, 1, 1], [], []>} : vector<32x512xbf16>, vector<512x64xbf16>, vector<32x64xf32> -> vector<32x64xf32>
    %c0_38 = arith.constant 0 : index
    %c0_39 = arith.constant 0 : index
    %98 = vector.load %arg9[%c0_38, %c0_39] : memref<4x64xf32, #tpu.memory_space<vmem>>, vector<1x64xf32>
    %99 = vector.broadcast %34 : vector<32x1xf32> to vector<32x64xf32>
    %100 = vector.broadcast %98 : vector<1x64xf32> to vector<32x64xf32>
    %101 = arith.mulf %99, %100 : vector<32x64xf32>
    %102 = arith.addf %97, %101 : vector<32x64xf32>
    %c1 = arith.constant 1 : index
    %c0_40 = arith.constant 0 : index
    %103 = vector.load %arg9[%c1, %c0_40] : memref<4x64xf32, #tpu.memory_space<vmem>>, vector<1x64xf32>
    %104 = vector.broadcast %44 : vector<32x1xf32> to vector<32x64xf32>
    %105 = vector.broadcast %103 : vector<1x64xf32> to vector<32x64xf32>
    %106 = arith.mulf %104, %105 : vector<32x64xf32>
    %107 = arith.addf %102, %106 : vector<32x64xf32>
    %c2 = arith.constant 2 : index
    %c0_41 = arith.constant 0 : index
    %108 = vector.load %arg9[%c2, %c0_41] : memref<4x64xf32, #tpu.memory_space<vmem>>, vector<1x64xf32>
    %109 = vector.broadcast %54 : vector<32x1xf32> to vector<32x64xf32>
    %110 = vector.broadcast %108 : vector<1x64xf32> to vector<32x64xf32>
    %111 = arith.mulf %109, %110 : vector<32x64xf32>
    %112 = arith.addf %107, %111 : vector<32x64xf32>
    %c3 = arith.constant 3 : index
    %c0_42 = arith.constant 0 : index
    %113 = vector.load %arg9[%c3, %c0_42] : memref<4x64xf32, #tpu.memory_space<vmem>>, vector<1x64xf32>
    %114 = vector.broadcast %63 : vector<32x1xf32> to vector<32x64xf32>
    %115 = vector.broadcast %113 : vector<1x64xf32> to vector<32x64xf32>
    %116 = arith.mulf %114, %115 : vector<32x64xf32>
    %117 = arith.addf %112, %116 : vector<32x64xf32>
    %118 = arith.addf %5, %117 : vector<32x64xf32>
    %119 = arith.truncf %118 : vector<32x64xf32> to vector<32x64xbf16>
    %c0_43 = arith.constant 0 : index
    %c0_44 = arith.constant 0 : index
    %120 = vector.load %arg10[%c0_43, %c0_44] : memref<64x14xbf16, #tpu.memory_space<vmem>>, vector<64x14xbf16>
    %cst_45 = arith.constant dense<0.000000e+00> : vector<32x14xf32>
    %121 = tpu.matmul %119, %120, %cst_45 {dimension_numbers = #tpu.dot_dimension_numbers<[1], [0], [0], [1], [0, 0, 1, 1], [], []>} : vector<32x64xbf16>, vector<64x14xbf16>, vector<32x14xf32> -> vector<32x14xf32>
    %c0_46 = arith.constant 0 : index
    %c0_47 = arith.constant 0 : index
    %122 = vector.load %arg11[%c0_46, %c0_47] : memref<1x14xf32, #tpu.memory_space<vmem>>, vector<1x14xf32>
    %123 = vector.broadcast %122 : vector<1x14xf32> to vector<32x14xf32>
    %124 = arith.addf %121, %123 : vector<32x14xf32>
    %125 = tpu.iota {dimensions = array<i32: 1>} : vector<32x14xi32>
    %c8_i32 = arith.constant 8 : i32
    %126 = vector.broadcast %c8_i32 : i32 to vector<32x14xi32>
    %127 = arith.cmpi slt, %125, %126 : vector<32x14xi32>
    %128 = arith.negf %124 : vector<32x14xf32>
    %129 = math.exp %128 : vector<32x14xf32>
    %cst_48 = arith.constant 1.000000e+00 : f32
    %130 = vector.broadcast %cst_48 : f32 to vector<32x14xf32>
    %131 = arith.addf %130, %129 : vector<32x14xf32>
    %132 = arith.divf %130, %131 : vector<32x14xf32>
    %133 = arith.select %127, %124, %132 : vector<32x14xi1>, vector<32x14xf32>
    %c0_49 = arith.constant 0 : index
    %c0_50 = arith.constant 0 : index
    %134 = vector.load %arg12[%c0_49, %c0_50] : memref<32x14xf32, #tpu.memory_space<vmem>>, vector<32x14xf32>
    tpu.vector_store %arg12[%c0_49, %c0_50], %133 {strides = array<i32>} : memref<32x14xf32, #tpu.memory_space<vmem>>, vector<32x14xf32>,
    return
  }
  func.func @transform_0(%arg0: i32) -> (i32, i32) {
    %c0_i32 = arith.constant 0 : i32
    %c0_i32_0 = arith.constant 0 : i32
    %c0_i32_1 = arith.constant 0 : i32
    return %c0_i32, %c0_i32_0 : i32, i32
  }
  func.func @transform_1(%arg0: i32) -> (i32, i32) {
    %c0_i32 = arith.constant 0 : i32
    %c0_i32_0 = arith.constant 0 : i32
    %c0_i32_1 = arith.constant 0 : i32
    return %c0_i32, %c0_i32_0 : i32, i32
  }
  func.func @transform_2(%arg0: i32) -> (i32, i32) {
    %c0_i32 = arith.constant 0 : i32
    %c0_i32_0 = arith.constant 0 : i32
    %c0_i32_1 = arith.constant 0 : i32
    return %c0_i32, %c0_i32_0 : i32, i32
  }
  func.func @transform_3(%arg0: i32) -> (i32, i32) {
    %c0_i32 = arith.constant 0 : i32
    %c0_i32_0 = arith.constant 0 : i32
    %c0_i32_1 = arith.constant 0 : i32
    return %c0_i32, %c0_i32_0 : i32, i32
  }
  func.func @transform_4(%arg0: i32) -> (i32, i32) {
    %c0_i32 = arith.constant 0 : i32
    %c0_i32_0 = arith.constant 0 : i32
    %c0_i32_1 = arith.constant 0 : i32
    return %c0_i32, %c0_i32_0 : i32, i32
  }
  func.func @transform_5(%arg0: i32) -> (i32, i32) {
    %c0_i32 = arith.constant 0 : i32
    %c0_i32_0 = arith.constant 0 : i32
    %c0_i32_1 = arith.constant 0 : i32
    return %c0_i32, %c0_i32_0 : i32, i32
  }
  func.func @transform_6(%arg0: i32) -> (i32, i32) {
    %c0_i32 = arith.constant 0 : i32
    %c0_i32_0 = arith.constant 0 : i32
    %c0_i32_1 = arith.constant 0 : i32
    return %c0_i32, %c0_i32_0 : i32, i32
  }
  func.func @transform_7(%arg0: i32) -> (i32, i32) {
    %c0_i32 = arith.constant 0 : i32
    %c0_i32_0 = arith.constant 0 : i32
    %c0_i32_1 = arith.constant 0 : i32
    return %c0_i32, %c0_i32_0 : i32, i32
  }
  func.func @transform_8(%arg0: i32) -> (i32, i32) {
    %c0_i32 = arith.constant 0 : i32
    %c0_i32_0 = arith.constant 0 : i32
    %c0_i32_1 = arith.constant 0 : i32
    return %c0_i32, %c0_i32_0 : i32, i32
  }
  func.func @transform_9(%arg0: i32) -> (i32, i32) {
    %c0_i32 = arith.constant 0 : i32
    %c0_i32_0 = arith.constant 0 : i32
    %c0_i32_1 = arith.constant 0 : i32
    return %c0_i32, %c0_i32_0 : i32, i32
  }
  func.func @transform_10(%arg0: i32) -> (i32, i32) {
    %c0_i32 = arith.constant 0 : i32
    %c0_i32_0 = arith.constant 0 : i32
    %c0_i32_1 = arith.constant 0 : i32
    return %c0_i32, %c0_i32_0 : i32, i32
  }
  func.func @transform_11(%arg0: i32) -> (i32, i32) {
    %c0_i32 = arith.constant 0 : i32
    %c0_i32_0 = arith.constant 0 : i32
    %c0_i32_1 = arith.constant 0 : i32
    return %c0_i32, %c0_i32_0 : i32, i32
  }
}

</mosaic_0001>

<bundles_post_ra>
// kernel: _validated_forward_jit.1
= control target key start
LH: loop header
LB: loop body
LE: loop exit
PB: predicated region body
PF: predicated region fallthrough
CT: control target
= control target key end

     0   :  { %vm92_vm0 = vcmask 523264   ;;  %v1844_v19 = vmov 0   ;;  %v476_v38 = vlaneseq  ;;  %vm244_vm1 = vcmask 31744   ;;  %s1848_s30 = smov 2   ;;  %s1849_s12 = smov 126   ;;  %s2614_s1 = inlined_call_operand.vmem [shape: bf16[64,64], index: 1, kind: input, shape index: {}]   ;;  %s2615_s0 = inlined_call_operand.vmem [shape: bf16[32,64], index: 0, kind: input, shape index: {}]   ;;  %s2616_s3 = inlined_call_operand.vmem [shape: bf16[64,4], index: 3, kind: input, shape index: {}]   ;;  %s2617_s5 = inlined_call_operand.vmem [shape: bf16[64,512], index: 5, kind: input, shape index: {}]   ;;  %s2618_s2 = inlined_call_operand.vmem [shape: f32[1,64], index: 2, kind: input, shape index: {}]   ;;  %s2619_s4 = inlined_call_operand.vmem [shape: f32[1,4], index: 4, kind: input, shape index: {}]   ;;  %s2620_s6 = inlined_call_operand.vmem [shape: f32[1,512], index: 6, kind: input, shape index: {}]   ;;  %s2621_s7 = inlined_call_operand.vmem [shape: bf16[512,64], index: 7, kind: input, shape index: {}]   ;;  %s2622_s9 = inlined_call_operand.vmem [shape: bf16[64,14], index: 9, kind: input, shape index: {}]   ;;  %s2623_s8 = inlined_call_operand.vmem [shape: f32[4,64], index: 8, kind: input, shape index: {}]   ;;  %s2624_s10 = inlined_call_operand.vmem [shape: f32[1,14], index: 10, kind: input, shape index: {}]   ;;  %s2625_s11 = inlined_call_operand.vmem [shape: f32[32,14], index: 11, kind: output, shape index: {}]  }
   0x1   :  { %v1710_v0 = vld [vmem:[%s2614_s1] sm:$0xff]   ;;  %v1711_v1 = vld [vmem:[%s2614_s1 + $0x8] sm:$0xff]   ;;  %v1712_v2 = vld [vmem:[%s2614_s1 + $0x10] sm:$0xff]   ;;  %1697 = vset.pattern.permute.xlu0 %v1844_v19  ;;  %s1851_s18 = smov 3  }
   0x2   :  { %1629 = vmatprep.subr.bf16.mxu0 %v1710_v0  ;;  %v1714_v3 = vld [vmem:[%s2615_s0] sm:$0xff]   ;;  %v1713_v5 = vld [vmem:[%s2614_s1 + $0x18] sm:$0xff]   ;;  %v1720_v6 = vld [vmem:[%s2616_s3 + $0x8] sm:$0xff]   ;;  %v2021_v39 = vshrl.u32 %v476_v38, 7 }
   0x3   :  { %1630 = vmatpush3.bf16.msra.mxu0 %v1710_v0  ;;  %1637 = vmatprep.mubr.msk.bf16.mxu0 %vm92_vm0, %v1714_v3  ;;  %v1716_v4 = vld [vmem:[%s2616_s3] sm:$0xff]   ;;  %v1715_v8 = vld [vmem:[%s2615_s0 + $0x8] sm:$0xff]   ;;  %v1724_v12 = vld [vmem:[%s2616_s3 + $0x10] sm:$0xff]  }
   0x4   :  { %1631 = vmatprep.subr.bf16.mxu0 %v1711_v1  ;;  %1641 = vmatprep.subr.bf16.mxu1 %v1716_v4  ;;  %v1719_v7 = vld [vmem:[%s2617_s5 + $0x4] ss:$16 sps:$4 sm:$0xff]   ;;  %v1717_v9 = vld [vmem:[%s2617_s5] ss:$16 sps:$4 sm:$0xff]   ;;  %v1728_v15 = vld [vmem:[%s2616_s3 + $0x18] sm:$0xff]   ;;  %v478_v47 = vsub.s32 0, %v2021_v39 }
   0x5   :  { %1642 = vmatpush3.bf16.msra.mxu1 %v1716_v4  ;;  %v1723_v10 = vld [vmem:[%s2617_s5 + $0x24] ss:$16 sps:$4 sm:$0xff]   ;;  %v1721_v11 = vld [vmem:[%s2617_s5 + $0x20] ss:$16 sps:$4 sm:$0xff]   ;;  %v1734_v18 = vld [vmem:[%s2617_s5 + $0xc] ss:$16 sps:$4 sm:$0xff]  }
   0x6   :  { %1643 = vmatprep.subr.bf16.mxu1 %v1720_v6  ;;  %v1727_v13 = vld [vmem:[%s2617_s5 + $0x44] ss:$16 sps:$4 sm:$0xff]   ;;  %v1725_v14 = vld [vmem:[%s2617_s5 + $0x40] ss:$16 sps:$4 sm:$0xff]   ;;  %v1732_v30 = vld [vmem:[%s2617_s5 + $0x8] ss:$16 sps:$4 sm:$0xff]  }
   0x7   :  { %1632 = vmatpush3.bf16.msra.mxu0 %v1711_v1  ;;  %v1731_v16 = vld [vmem:[%s2617_s5 + $0x64] ss:$16 sps:$4 sm:$0xff]   ;;  %v1729_v17 = vld [vmem:[%s2617_s5 + $0x60] ss:$16 sps:$4 sm:$0xff]   ;;  %v1737_v32 = vld [vmem:[%s2617_s5 + $0x2c] ss:$16 sps:$4 sm:$0xff]  }
   0x8   :  { %1633 = vmatprep.subr.bf16.mxu0 %v1712_v2  ;;  %v1472_v21 = vld [vmem:[%s2618_s2] ss:$0 sm:$0xff]  ;;  %v1735_v33 = vld [vmem:[%s2617_s5 + $0x28] ss:$16 sps:$4 sm:$0xff]   ;;  %v1740_v34 = vld [vmem:[%s2617_s5 + $0x4c] ss:$16 sps:$4 sm:$0xff]  }
   0x9   :  { %1644 = vmatpush3.bf16.msra.mxu1 %v1720_v6  ;;  %v1738_v35 = vld [vmem:[%s2617_s5 + $0x48] ss:$16 sps:$4 sm:$0xff]   ;;  %v1743_v36 = vld [vmem:[%s2617_s5 + $0x6c] ss:$16 sps:$4 sm:$0xff]   ;;  %v1481_v40 = vld [vmem:[%s2619_s4] ss:$0 sm:$0xff] }
   0xa   :  { %1645 = vmatprep.subr.bf16.mxu1 %v1724_v12  ;;  %v1741_v37 = vld [vmem:[%s2617_s5 + $0x68] ss:$16 sps:$4 sm:$0xff]   ;;  %v2038_v51 = vld [vmem:[%s2620_s6] sm:$0xf]  ;;  %s1846_s4 = smov 1   ;;  %s1847_s6 = smov 127  }
   0xb   :  { %1634 = vmatpush3.bf16.msra.mxu0 %v1712_v2  ;;  %v2043_v57 = vrot.slane %v2038_v51, %v478_v47 }
   0xc   :  { %1635 = vmatprep.subr.bf16.mxu0 %v1713_v5 }
   0xd   :  { %1646 = vmatpush3.bf16.msra.mxu1 %v1724_v12 }
   0xe   :  { %1647 = vmatprep.subr.bf16.mxu1 %v1728_v15 }
   0xf   :  { %1636 = vmatpush3.bf16.msra.mxu0 %v1713_v5 }
  0x10   :  { %576 = vmatprep.subr.bf16.mxu0 %v1719_v7 }
  0x11   :  { %1648 = vmatpush3.bf16.msra.mxu1 %v1728_v15 }
  0x12   :  { %1638 = vmatmul.mubr.msk.bf16.vlgmr.msra.gmra.mrb[0].mxu0 %vm92_vm0, %v1715_v8  ;;  %629 = vmatprep.subr.bf16.mxu1 %v1734_v18 }
  0x13   :  { %577 = vmatpush1.bf16.msra.mxu0 %v1717_v9  ;;  %608 = vmatprep.mubr.bf16.mxu0 %v1844_v19 }
  0x14   :  { %578 = vmatprep.subr.bf16.mxu0 %v1723_v10 }
  0x17   :  { %579 = vmatpush1.bf16.msra.mxu0 %v1721_v11 }
  0x18   :  { %580 = vmatprep.subr.bf16.mxu0 %v1727_v13 }
  0x1b   :  { %581 = vmatpush1.bf16.msra.mxu0 %v1725_v14 }
  0x1c   :  { %582 = vmatprep.subr.bf16.mxu0 %v1731_v16 }
  0x1f   :  { %583 = vmatpush1.bf16.msra.mxu0 %v1729_v17 }
  0xe5   :  { %v1639_v20 = vpop.f32.mrb[0].mxu0 }
  0xe6   :  { %v133_v22 = vpop.f32.mrb[1].mxu0  ;;  %v1984_v28 = vadd.f32 %v1639_v20, %v1472_v21 }
  0xe7   :  { %v1640_v23 = vpop.f32.mrb[2].mxu0  ;;  %v1980_v26 = vadd.f32 %v1472_v21, %v133_v22 }
  0xe8   :  { %v1978_v24 = vadd.f32 %v1640_v23, %v1472_v21  ;;  %v136_v25 = vpop.f32.mrb[3].mxu0 }
  0xe9   :  { %v1982_v27 = vadd.f32 %v1472_v21, %v136_v25 }
  0xea   :  { %v149_v31 = vpack.c.bf16 %v1978_v24, %v1984_v28 }
  0xeb   :  { %v148_v29 = vpack.c.bf16 %v1982_v27, %v1980_v26 }
  0xed   :  { %1649 = vmatprep.mubr.msk.bf16.mxu1 %vm92_vm0, %v148_v29  ;;  %1504 = vmatmul.mubr.msk.bf16.vlgmr.msra.gmra.mrb[4].mxu0 %vm92_vm0, %v148_v29 }
  0xee   :  { %1650 = vmatmul.mubr.msk.bf16.vlgmr.msra.gmra.mrb[0].mxu1 %vm92_vm0, %v149_v31  ;;  %618 = vmatprep.mubr.bf16.mxu0 %v1844_v19 }
  0xef   :  { %630 = vmatpush1.bf16.msra.mxu1 %v1732_v30  ;;  %661 = vmatprep.mubr.bf16.mxu1 %v1844_v19 }
  0xf0   :  { %631 = vmatprep.subr.bf16.mxu1 %v1737_v32 }
  0xf3   :  { %632 = vmatpush1.bf16.msra.mxu1 %v1735_v33 }
  0xf4   :  { %633 = vmatprep.subr.bf16.mxu1 %v1740_v34 }
  0xf5   :  { %1505 = vmatmul.mubr.msk.bf16.gmra.mrb[8].mxu0 %vm92_vm0, %v149_v31 }
  0xf7   :  { %634 = vmatpush1.bf16.msra.mxu1 %v1738_v35 }
  0xf8   :  { %635 = vmatprep.subr.bf16.mxu1 %v1743_v36 }
  0xfb   :  { %636 = vmatpush1.bf16.msra.mxu1 %v1741_v37 }
  0xfe   :  { %1506 = vmatmul.mubr.msk.bf16.vlgmr.msra.gmra.mrb[4].mxu1 %vm92_vm0, %v148_v29 }
  0xff   :  { %671 = vmatprep.mubr.bf16.mxu1 %v1844_v19 }
 0x106   :  { %1507 = vmatmul.mubr.msk.bf16.gmra.mrb[8].mxu1 %vm92_vm0, %v149_v31 }
 0x1c0   :  { %v2026_v41 = vpop.f32.mrb[4].mxu0 }
 0x1c1   :  { %v1651_v42 = vpop.f32.mrb[0].mxu1  ;;  %v2028_v43 = vpop.f32.mrb[5].mxu0 }
 0x1c2   :  { %v238_v44 = vadd.f32 %v1651_v42, %v1481_v40  ;;  %v229_v45 = vpop.f32.mrb[1].mxu1  ;;  %v2030_v46 = vpop.f32.mrb[6].mxu0 }
 0x1c3   :  { %v230_v48 = vadd.f32 %v1481_v40, %v229_v45  ;;  %v1652_v49 = vpop.f32.mrb[2].mxu1  ;;  %v2033_v50 = vpop.f32.mrb[7].mxu0 }
 0x1c4   :  { %v241_v52 = vadd.f32 %v1652_v49, %v1481_v40  ;;  %v232_v53 = vpop.f32.mrb[3].mxu1  ;;  %v251_v54 = vsel %vm244_vm1, %v238_v44, -inf }
 0x1c5   :  { %v233_v55 = vadd.f32 %v1481_v40, %v232_v53  ;;  %252 = vmax.xlane.f32.xlu1 %v251_v54  ;;  %v245_v56 = vsel %vm244_vm1, %v230_v48, -inf }
 0x1c6   :  { %246 = vmax.xlane.f32.xlu0 %v245_v56  ;;  %v254_v59 = vsel %vm244_vm1, %v241_v52, -inf }
 0x1c7   :  { %v248_v62 = vsel %vm244_vm1, %v233_v55, -inf }
 0x1c8   :  { %v620_v58 = vpop.f32.mrb[8].mxu0 }
 0x1c9   :  { %v2047_v60 = vadd.f32 %v620_v58, %v2043_v57  ;;  %v2049_v61 = vpop.f32.mrb[9].mxu0  ;;  %255 = vmax.xlane.f32.xlu1 %v254_v59 }
 0x1ca   :  { %v624_v63 = vpop.f32.mrb[10].mxu0  ;;  %249 = vmax.xlane.f32.xlu0 %v248_v62  ;;  %v1845_v62 = vmov 0.0  }
 0x1cb   :  { %v2053_v0 = vadd.f32 %v624_v63, %v2043_v57  ;;  %v2055_v1 = vpop.f32.mrb[11].mxu0 }
 0x1d1   :  { %v2057_v2 = vpop.f32.mrb[4].mxu1 }
 0x1d2   :  { %v2059_v3 = vpop.f32.mrb[5].mxu1 }
 0x1d3   :  { %v2061_v4 = vpop.f32.mrb[6].mxu1 }
 0x1d4   :  { %v2063_v5 = vpop.f32.mrb[7].mxu1 }
 0x1d9   :  { %v2065_v6 = vpop.f32.mrb[8].mxu1 }
 0x1da   :  { %v2067_v7 = vpop.f32.mrb[9].mxu1 }
 0x1db   :  { %v2069_v8 = vpop.f32.mrb[10].mxu1 }
 0x1dc   :  { %v2071_v9 = vpop.f32.mrb[11].mxu1 }
 0x252   :  { %v253_v10 = vpop.xlane.xlu1 %252 }
 0x253   :  { %v259_v11 = vsub.f32 %v238_v44, %v253_v10  ;;  %v247_v12 = vpop.xlane.xlu0 %246 }
 0x254   :  { %v257_v13 = vsub.f32 %v230_v48, %v247_v12 }
 0x255   :  { %v265_v14 = vmul.f32 1.442695, %v259_v11 }
 0x256   :  { %v261_v15 = vmul.f32 1.442695, %v257_v13  ;;  %v256_v16 = vpop.xlane.xlu1 %255 }
 0x257   :  { %v260_v17 = vsub.f32 %v241_v52, %v256_v16  ;;  %v250_v18 = vpop.xlane.xlu0 %249 }
 0x258   :  { %1780 = vpow2.f32 %v261_v15  ;;  %v258_v20 = vsub.f32 %v233_v55, %v250_v18 }
 0x259   :  { %1782 = vpow2.f32 %v265_v14  ;;  %v267_v21 = vmul.f32 1.442695, %v260_v17 }
 0x25a   :  { %v263_v22 = vmul.f32 1.442695, %v258_v20 }
 0x25c   :  { %1784 = vpow2.f32 %v263_v22 }
 0x25d   :  { %1786 = vpow2.f32 %v267_v21 }
 0x262   :  { %v1781_v23 = vpop.eup %1780 }
 0x263   :  { %v269_v25 = vsel %vm244_vm1, %v1781_v23, 0.0  ;;  %v1783_v29 = vpop.eup %1782 }
 0x264   :  { %270 = vadd.xlane.f32.xlu0 %v269_v25  ;;  %v275_v31 = vsel %vm244_vm1, %v1783_v29, 0.0 }
 0x266   :  { %v1785_v30 = vpop.eup %1784 }
 0x267   :  { %v272_v32 = vsel %vm244_vm1, %v1785_v30, 0.0  ;;  %v1787_v33 = vpop.eup %1786 }
 0x268   :  { %276 = vadd.xlane.f32.xlu0 %v275_v31  ;;  %273 = vadd.xlane.f32.xlu1 %v272_v32  ;;  %v278_v34 = vsel %vm244_vm1, %v1787_v33, 0.0 }
 0x26c   :  { %279 = vadd.xlane.f32.xlu1 %v278_v34 }
 0x2f1   :  { %v271_v35 = vpop.xlane.xlu0 %270 }
 0x2f2   :  { %1788 = vrcp.f32 %v271_v35 }
 0x2f5   :  { %v274_v36 = vpop.xlane.xlu1 %273  ;;  %v277_v37 = vpop.xlane.xlu0 %276 }
 0x2f6   :  { %1790 = vrcp.f32 %v274_v36 }
 0x2f7   :  { %1792 = vrcp.f32 %v277_v37 }
 0x2f9   :  { %v280_v40 = vpop.xlane.xlu1 %279 }
 0x2fa   :  { %1794 = vrcp.f32 %v280_v40 }
 0x2fc   :  { %v1789_v42 = vpop.eup %1788 }
 0x2fd   :  { %v2077_v44 = vmul.f32 %v1789_v42, %v1781_v23 }
 0x2ff   :  { %v289_v45 = vsel %vm244_vm1, %v2077_v44, -inf }
 0x300   :  { %v1791_v47 = vpop.eup %1790  ;;  %290 = vmax.xlane.f32.xlu0 %v289_v45 }
 0x301   :  { %v1793_v48 = vpop.eup %1792  ;;  %v2081_v49 = vmul.f32 %v1791_v47, %v1785_v30 }
 0x302   :  { %v2083_v52 = vmul.f32 %v1793_v48, %v1783_v29 }
 0x303   :  { %v292_v53 = vsel %vm244_vm1, %v2081_v49, -inf }
 0x304   :  { %v1795_v54 = vpop.eup %1794  ;;  %293 = vmax.xlane.f32.xlu1 %v292_v53  ;;  %v295_v55 = vsel %vm244_vm1, %v2083_v52, -inf }
 0x305   :  { %v2089_v56 = vmul.f32 %v1795_v54, %v1787_v33  ;;  %296 = vmax.xlane.f32.xlu0 %v295_v55 }
 0x307   :  { %v298_v58 = vsel %vm244_vm1, %v2089_v56, -inf }
 0x308   :  { %299 = vmax.xlane.f32.xlu1 %v298_v58 }
 0x38d   :  { %v2093_v59 = vpop.xlane.xlu0 %290 }
 0x38e   :  { %vm301_vm2 = vcmp.ge.f32.partialorder %v2077_v44, %v2093_v59  ;;  %v1772_v59 = vld [vmem:[%s2621_s7 + $0xf0] sm:$0xff]  }
 0x38f   :  { %v2101_v63 = vsel %vm301_vm2, 1.0, %v1845_v62 }
 0x390   :  { %v314_v10 = vsub.f32 1.0, %v2101_v63 }
 0x391   :  { %v2104_v11 = vpop.xlane.xlu1 %293 }
 0x392   :  { %vm302_vm3 = vcmp.ge.f32.partialorder %v2081_v49, %v2104_v11  ;;  %v2108_v12 = vpop.xlane.xlu0 %296  ;;  %vm322_vm4 = vcmp.gt.f32.partialorder %v314_v10, 0.0 }
 0x393   :  { %v2114_v13 = vsel %vm302_vm3, 1.0, %v1845_v62  ;;  %vm303_vm5 = vcmp.ge.f32.partialorder %v2083_v52, %v2108_v12  ;;  %v326_v14 = vsel %vm322_vm4, 1, %v1844_v19  ;;  %v1775_v12 = vld [vmem:[%s2621_s7 + $0xb8] sm:$0xff]  }
 0x394   :  { %v2123_v15 = vsel %vm303_vm5, 1.0, %v1845_v62  ;;  %330 = vrot.lane.b32.xlu0 %v326_v14, %s1846_s4  ;;  %v315_v16 = vsub.f32 1.0, %v2114_v13 }
 0x395   :  { %v2126_v17 = vpop.xlane.xlu1 %299  ;;  %v316_v18 = vsub.f32 1.0, %v2123_v15 }
 0x396   :  { %vm304_vm6 = vcmp.ge.f32.partialorder %v2089_v56, %v2126_v17  ;;  %vm323_vm7 = vcmp.gt.f32.partialorder %v315_v16, 0.0 }
 0x397   :  { %v2135_v20 = vsel %vm304_vm6, 1.0, %v1845_v62  ;;  %v327_v21 = vsel %vm323_vm7, 1, %v1844_v19  ;;  %vm324_vm8 = vcmp.gt.f32.partialorder %v316_v18, 0.0 }
 0x398   :  { %332 = vrot.lane.b32.xlu1 %v327_v21, %s1846_s4  ;;  %v317_v22 = vsub.f32 1.0, %v2135_v20  ;;  %v328_v23 = vsel %vm324_vm8, 1, %v1844_v19 }
 0x39a   :  { %vm325_vm9 = vcmp.gt.f32.partialorder %v317_v22, 0.0 }
 0x39b   :  { %v329_v25 = vsel %vm325_vm9, 1, %v1844_v19 }
 0x39c   :  { %334 = vrot.lane.b32.xlu1 %v328_v23, %s1846_s4 }
 0x3a0   :  { %336 = vrot.lane.b32.xlu1 %v329_v25, %s1846_s4 }
 0x406   :  { %v331_v29 = vpop.permute.xlu0 %330 }
 0x407   :  { %vm338_vm10 = vcmp.ne.s32.totalorder %v331_v29, 0 }
 0x408   :  { %vm342_vm11 = vmand %vm301_vm2, %vm338_vm10 }
 0x409   :  { %v2148_v31 = vsel %vm342_vm11, 1.0, %v1845_v62 }
 0x40a   :  { %v333_v30 = vpop.permute.xlu1 %332 }
 0x40b   :  { %vm339_vm12 = vcmp.ne.s32.totalorder %v333_v30, 0 }
 0x40c   :  { %vm343_vm13 = vmand %vm302_vm3, %vm339_vm12 }
 0x40d   :  { %v2151_v32 = vsel %vm343_vm13, 1.0, %v1845_v62 }
 0x40e   :  { %v1675_v33 = vpack.i.bf16 %v2151_v32, %v2148_v31  ;;  %v335_v34 = vpop.permute.xlu1 %334 }
 0x40f   :  { %vm340_vm14 = vcmp.ne.s32.totalorder %v335_v34, 0 }
 0x410   :  { %1676 = vrot.lane.b32.xlu0 %v1675_v33, %s1847_s6  ;;  %vm344_vm15 = vmand %vm303_vm5, %vm340_vm14 }
 0x411   :  { %v2162_v36 = vsel %vm344_vm15, 1.0, %v1845_v62 }
 0x412   :  { %v337_v35 = vpop.permute.xlu1 %336 }
 0x413   :  { %vm341_vm1 = vcmp.ne.s32.totalorder %v337_v35, 0 }
 0x414   :  { %vm345_vm4 = vmand %vm304_vm6, %vm341_vm1 }
 0x415   :  { %v2165_v37 = vsel %vm345_vm4, 1.0, %v1845_v62 }
 0x416   :  { %v1680_v40 = vpack.i.bf16 %v2165_v37, %v2162_v36 }
 0x418   :  { %1681 = vrot.lane.b32.xlu1 %v1680_v40, %s1847_s6  ;;  %v1850_v40 = vmov 1  }
 0x419   :  { %1695 = vset.pattern.permute.xlu1 %v1850_v40 }
 0x482   :  { %v1677_v42 = vpop.permute.xlu0 %1676 }
 0x483   :  { %v1679_v45 = vunpack.i.h.bf16 %v1677_v42  ;;  %v1678_v47 = vunpack.i.l.bf16 %v1677_v42 }
 0x485   :  { %v367_v48 = vsub.f32 %v315_v16, %v1679_v45  ;;  %v366_v53 = vsub.f32 %v314_v10, %v1678_v47 }
 0x487   :  { %vm375_vm7 = vcmp.gt.f32.partialorder %v367_v48, 0.0  ;;  %vm374_vm8 = vcmp.gt.f32.partialorder %v366_v53, 0.0 }
 0x488   :  { %v379_v54 = vsel %vm375_vm7, 1, %v1844_v19  ;;  %v378_v55 = vsel %vm374_vm8, 1, %v1844_v19 }
 0x489   :  { %384 = vrot.lane.b32.xlu1 %v379_v54, %s1848_s30  ;;  %382 = vrot.lane.b32.xlu0 %v378_v55, %s1848_s30 }
 0x48a   :  { %v1682_v58 = vpop.permute.xlu1 %1681 }
 0x48b   :  { %v1684_v14 = vunpack.i.h.bf16 %v1682_v58  ;;  %v1683_v21 = vunpack.i.l.bf16 %v1682_v58 }
 0x48d   :  { %v369_v23 = vsub.f32 %v317_v22, %v1684_v14  ;;  %v368_v25 = vsub.f32 %v316_v18, %v1683_v21  ;;  %v1744_v14 = vld [vmem:[%s2621_s7 + $0x40] sm:$0xff]  }
 0x48e   :  { %v1745_v21 = vld [vmem:[%s2621_s7] sm:$0xff]   ;;  %1567 = vmatprep.subr.bf16.mxu0 %v1744_v14  ;;  %v1750_v14 = vld [vmem:[%s2621_s7 + $0x58] sm:$0xff]  }
 0x48f   :  { %vm377_vm9 = vcmp.gt.f32.partialorder %v369_v23, 0.0  ;;  %vm376_vm10 = vcmp.gt.f32.partialorder %v368_v25, 0.0  ;;  %1568 = vmatpush3.bf16.msra.mxu0 %v1745_v21 }
 0x490   :  { %v381_v29 = vsel %vm377_vm9, 1, %v1844_v19  ;;  %v380_v10 = vsel %vm376_vm10, 1, %v1844_v19 }
 0x491   :  { %388 = vrot.lane.b32.xlu1 %v381_v29, %s1848_s30  ;;  %386 = vrot.lane.b32.xlu0 %v380_v10, %s1848_s30 }
 0x4fb   :  { %v385_v16 = vpop.permute.xlu1 %384  ;;  %v383_v30 = vpop.permute.xlu0 %382 }
 0x4fc   :  { %vm391_vm11 = vcmp.ne.s32.totalorder %v385_v16, 0  ;;  %vm390_vm12 = vcmp.ne.s32.totalorder %v383_v30, 0  ;;  %v1746_v16 = vld [vmem:[%s2621_s7 + $0x48] sm:$0xff]  }
 0x4fd   :  { %vm395_vm13 = vmand %vm302_vm3, %vm391_vm11  ;;  %1569 = vmatprep.subr.bf16.mxu0 %v1746_v16  ;;  %v1752_v16 = vld [vmem:[%s2621_s7 + $0x60] sm:$0xff]  }
 0x4fe   :  { %v2177_v33 = vsel %vm395_vm13, 1.0, %v1845_v62  ;;  %vm394_vm14 = vmand %vm301_vm2, %vm390_vm12 }
 0x4ff   :  { %v2183_v18 = vsel %vm394_vm14, 1.0, %v1845_v62 }
 0x500   :  { %v1685_v22 = vpack.i.bf16 %v2177_v33, %v2183_v18 }
 0x502   :  { %1686 = vrot.lane.b32.xlu0 %v1685_v22, %s1849_s12 }
 0x503   :  { %v389_v34 = vpop.permute.xlu1 %388  ;;  %v387_v35 = vpop.permute.xlu0 %386 }
 0x504   :  { %vm393_vm15 = vcmp.ne.s32.totalorder %v389_v34, 0  ;;  %vm392_vm1 = vcmp.ne.s32.totalorder %v387_v35, 0  ;;  %v1747_v34 = vld [vmem:[%s2621_s7 + $0x8] sm:$0xff]  }
 0x505   :  { %vm397_vm4 = vmand %vm304_vm6, %vm393_vm15  ;;  %1570 = vmatpush3.bf16.msra.mxu0 %v1747_v34  ;;  %v318_v34 = vmul.f32 %v2101_v63, %v2077_v44  ;;  %v370_v63 = vmul.f32 %v2148_v31, %v2077_v44  ;;  %v1759_v31 = vld [vmem:[%s2621_s7 + $0x38] sm:$0xff]  }
 0x506   :  { %v2192_v42 = vsel %vm397_vm4, 1.0, %v1845_v62  ;;  %vm396_vm7 = vmand %vm303_vm5, %vm392_vm1 }
 0x507   :  { %v2198_v45 = vsel %vm396_vm7, 1.0, %v1845_v62 }
 0x508   :  { %v1690_v47 = vpack.i.bf16 %v2192_v42, %v2198_v45 }
 0x50a   :  { %1691 = vrot.lane.b32.xlu1 %v1690_v47, %s1849_s12  ;;  %v1748_v47 = vld [vmem:[%s2621_s7 + $0x50] sm:$0xff]  }
 0x50b   :  { %1571 = vmatprep.subr.bf16.mxu0 %v1748_v47  ;;  %v373_v47 = vmul.f32 %v2165_v37, %v2089_v56  ;;  %v320_v37 = vmul.f32 %v2123_v15, %v2083_v52  ;;  %v1763_v15 = vld [vmem:[%s2621_s7 + $0x88] sm:$0xff]  }
 0x574   :  { %v1687_v54 = vpop.permute.xlu0 %1686 }
 0x575   :  { %v1689_v55 = vunpack.i.h.bf16 %v1687_v54  ;;  %v1688_v58 = vunpack.i.l.bf16 %v1687_v54  ;;  %v1749_v54 = vld [vmem:[%s2621_s7 + $0x10] sm:$0xff]  }
 0x576   :  { %1572 = vmatpush3.bf16.msra.mxu0 %v1749_v54  ;;  %v1758_v54 = vld [vmem:[%s2621_s7 + $0x78] sm:$0xff]  }
 0x577   :  { %v419_v29 = vsub.f32 %v367_v48, %v1689_v55  ;;  %v418_v10 = vsub.f32 %v366_v53, %v1688_v58  ;;  %1573 = vmatprep.subr.bf16.mxu0 %v1750_v14  ;;  %v1764_v14 = vld [vmem:[%s2621_s7 + $0xd0] sm:$0xff]  }
 0x579   :  { %vm427_vm8 = vcmp.gt.f32.partialorder %v419_v29, 0.0  ;;  %vm426_vm9 = vcmp.gt.f32.partialorder %v418_v10, 0.0  ;;  %v1751_v10 = vld [vmem:[%s2621_s7 + $0x18] sm:$0xff]  }
 0x57a   :  { %v431_v30 = vsel %vm427_vm8, 1, %v1844_v19  ;;  %v430_v22 = vsel %vm426_vm9, 1, %v1844_v19  ;;  %1574 = vmatpush3.bf16.msra.mxu0 %v1751_v10  ;;  %v1767_v10 = vld [vmem:[%s2621_s7 + $0x98] sm:$0xff]  }
 0x57b   :  { %436 = vrot.lane.b32.xlu1 %v431_v30, %s1851_s18  ;;  %434 = vrot.lane.b32.xlu0 %v430_v22, %s1851_s18  ;;  %v1753_v30 = vld [vmem:[%s2621_s7 + $0x20] sm:$0xff]   ;;  %v1754_v22 = vld [vmem:[%s2621_s7 + $0x68] sm:$0xff]  }
 0x57c   :  { %v1692_v48 = vpop.permute.xlu1 %1691  ;;  %1575 = vmatprep.subr.bf16.mxu0 %v1752_v16  ;;  %v1770_v16 = vld [vmem:[%s2621_s7 + $0xe8] sm:$0xff]  }
 0x57d   :  { %v1694_v53 = vunpack.i.h.bf16 %v1692_v48  ;;  %v1693_v35 = vunpack.i.l.bf16 %v1692_v48  ;;  %v1852_v48 = vmov 2  }
 0x57e   :  { %1576 = vmatpush3.bf16.msra.mxu0 %v1753_v30  ;;  %v1771_v30 = vld [vmem:[%s2621_s7 + $0xa8] sm:$0xff]  }
 0x57f   :  { %v421_v55 = vsub.f32 %v369_v23, %v1694_v53  ;;  %v420_v58 = vsub.f32 %v368_v25, %v1693_v35  ;;  %v371_v23 = vmul.f32 %v2151_v32, %v2081_v49  ;;  %v319_v25 = vmul.f32 %v2114_v13, %v2081_v49  ;;  %v1755_v13 = vld [vmem:[%s2621_s7 + $0x28] sm:$0xff]   ;;  %1577 = vmatprep.subr.bf16.mxu0 %v1754_v22  ;;  %v1756_v53 = vld [vmem:[%s2621_s7 + $0x70] sm:$0xff]  }
 0x580   :  { %v422_v32 = vmul.f32 %v2183_v18, %v2077_v44  ;;  %v1757_v18 = vld [vmem:[%s2621_s7 + $0x30] sm:$0xff]   ;;  %v423_v35 = vmul.f32 %v2177_v33, %v2081_v49  ;;  %v372_v33 = vmul.f32 %v2162_v36, %v2083_v52  ;;  %v1761_v36 = vld [vmem:[%s2621_s7 + $0x80] sm:$0xff]   ;;  %v486_v22 = vsub.s32 2, %v2021_v39 }
 0x581   :  { %vm429_vm10 = vcmp.gt.f32.partialorder %v421_v55, 0.0  ;;  %vm428_vm11 = vcmp.gt.f32.partialorder %v420_v58, 0.0  ;;  %v1853_v55 = vmov 3   ;;  %v1760_v58 = vld [vmem:[%s2621_s7 + $0xc0] sm:$0xff]  }
 0x582   :  { %v433_v21 = vsel %vm429_vm10, 1, %v1844_v19  ;;  %v432_v29 = vsel %vm428_vm11, 1, %v1844_v19  ;;  %1578 = vmatpush3.bf16.msra.mxu0 %v1755_v13  ;;  %1595 = vmatprep.subr.bf16.mxu1 %v1760_v58  ;;  %v482_v13 = vsub.s32 1, %v2021_v39 }
 0x583   :  { %440 = vrot.lane.b32.xlu1 %v433_v21, %s1851_s18  ;;  %438 = vrot.lane.b32.xlu0 %v432_v29, %s1851_s18  ;;  %v1765_v21 = vld [vmem:[%s2621_s7 + $0x90] sm:$0xff]   ;;  %v1766_v29 = vld [vmem:[%s2621_s7 + $0xd8] sm:$0xff]  }
 0x584   :  { %1579 = vmatprep.subr.bf16.mxu0 %v1756_v53  ;;  %1596 = vmatpush3.bf16.msra.mxu1 %v1761_v36  ;;  %v483_v53 = vrot.slane %v2038_v51, %v482_v13 }
 0x586   :  { %1580 = vmatpush3.bf16.msra.mxu0 %v1757_v18  ;;  %v2328_v18 = vadd.f32 %v2030_v46, %v2043_v57  ;;  %v2363_v36 = vadd.f32 %v2049_v61, %v483_v53 }
 0x587   :  { %857 = vperm.xlu1 %1695, %v371_v23   ;;  %833 = vperm.xlu0 %1697, %v319_v25   ;;  %v1768_v23 = vld [vmem:[%s2621_s7 + $0xe0] sm:$0xff]  }
 0x588   :  { %1581 = vmatprep.subr.bf16.mxu0 %v1758_v54  ;;  %v1769_v25 = vld [vmem:[%s2621_s7 + $0xa0] sm:$0xff]   ;;  %v2342_v54 = vadd.f32 %v2033_v50, %v483_v53 }
 0x58a   :  { %1582 = vmatpush3.bf16.msra.mxu0 %v1759_v31 }
 0x58b   :  { %1696 = vset.pattern.permute.xlu1 %v1844_v19  ;;  %1698 = vset.pattern.permute.xlu0 %v1852_v48 }
 0x58c   :  { %828 = vperm.xlu1 %1696, %v318_v34   ;;  %876 = vperm.xlu0 %1698, %v422_v32   ;;  %v2319_v32 = vrot.slane %v2038_v51, %v486_v22  ;;  %v2323_v34 = vadd.f32 %v2026_v41, %v2043_v57  ;;  %v686_v41 = vmul.f32 %v2328_v18, %v2328_v18 }
 0x58e   :  { %v2348_v57 = vadd.f32 %v2061_v4, %v2319_v32 }
 0x590   :  { %1700 = vset.pattern.permute.xlu1 %v1852_v48  ;;  %1699 = vset.pattern.permute.xlu0 %v1850_v40  ;;  %v688_v58 = vmul.f32 %v2348_v57, %v2348_v57 }
 0x591   :  { %881 = vperm.xlu1 %1700, %v423_v35   ;;  %852 = vperm.xlu0 %1699, %v370_v63   ;;  %v2332_v63 = vadd.f32 %v2057_v2, %v2319_v32  ;;  %v682_v35 = vmul.f32 %v2323_v34, %v2323_v34 }
 0x593   :  { %v684_v46 = vmul.f32 %v2332_v63, %v2332_v63  ;;  %v698_v2 = vmul.f32 %v682_v35, %v2323_v34 }
 0x595   :  { %1701 = vset.pattern.permute.xlu1 %v1850_v40  ;;  %867 = vperm.xlu0 %1699, %v373_v47   ;;  %v1762_v40 = vld [vmem:[%s2621_s7 + $0xc8] sm:$0xff]   ;;  %v2337_v47 = vadd.f32 %v2028_v43, %v483_v53  ;;  %v702_v43 = vmul.f32 %v686_v41, %v2328_v18  ;;  %v700_v50 = vmul.f32 %v684_v46, %v2332_v63  ;;  %v714_v4 = vmul.f32 0.044715, %v698_v2 }
 0x596   :  { %862 = vperm.xlu1 %1701, %v372_v33   ;;  %1597 = vmatprep.subr.bf16.mxu1 %v1762_v40  ;;  %v687_v33 = vmul.f32 %v2342_v54, %v2342_v54 }
 0x597   :  { %1598 = vmatpush3.bf16.msra.mxu1 %v1763_v15  ;;  %v683_v31 = vmul.f32 %v2337_v47, %v2337_v47  ;;  %v718_v15 = vmul.f32 0.044715, %v702_v43 }
 0x598   :  { %1599 = vmatprep.subr.bf16.mxu1 %v1764_v14  ;;  %v703_v14 = vmul.f32 %v687_v33, %v2342_v54 }
 0x599   :  { %1705 = vset.pattern.permute.xlu0 %v1853_v55  ;;  %v699_v40 = vmul.f32 %v683_v31, %v2337_v47  ;;  %v734_v61 = vadd.f32 %v718_v15, %v2328_v18 }
 0x59a   :  { %1702 = vset.pattern.permute.xlu1 %v1844_v19 }
 0x59b   :  { %838 = vperm.xlu1 %1702, %v320_v37   ;;  %1600 = vmatpush3.bf16.msra.mxu1 %v1765_v21  ;;  %v2358_v37 = vadd.f32 %v2055_v1, %v483_v53  ;;  %v716_v21 = vmul.f32 0.044715, %v700_v50  ;;  %v730_v1 = vadd.f32 %v714_v4, %v2323_v34  ;;  %v750_v31 = vmul.f32 0.7978846, %v734_v61 }
 0x59c   :  { %1601 = vmatprep.subr.bf16.mxu1 %v1766_v29 }
 0x59d   :  { %v695_v29 = vmul.f32 %v2358_v37, %v2358_v37  ;;  %v746_v41 = vmul.f32 0.7978846, %v730_v1 }
 0x59f   :  { %1703 = vset.pattern.permute.xlu1 %v1853_v55  ;;  %1602 = vmatpush3.bf16.msra.mxu1 %v1767_v10  ;;  %v704_v10 = vmul.f32 %v688_v58, %v2348_v57  ;;  %v711_v53 = vmul.f32 %v695_v29, %v2358_v37  ;;  %1796 = vtanh.f32 %v746_v41 }
 0x5a0   :  { %1603 = vmatprep.subr.bf16.mxu1 %v1768_v23  ;;  %v691_v23 = vmul.f32 %v2363_v36, %v2363_v36  ;;  %1798 = vtanh.f32 %v750_v31 }
 0x5a1   :  { %v720_v35 = vmul.f32 0.044715, %v704_v10  ;;  %v727_v58 = vmul.f32 0.044715, %v711_v53  ;;  %v321_v53 = vmul.f32 %v2135_v20, %v2089_v56 }
 0x5a2   :  { %v707_v46 = vmul.f32 %v691_v23, %v2363_v36 }
 0x5a3   :  { %1604 = vmatpush3.bf16.msra.mxu1 %v1769_v25  ;;  %v715_v25 = vmul.f32 0.044715, %v699_v40  ;;  %v736_v4 = vadd.f32 %v720_v35, %v2348_v57 }
 0x5a4   :  { %1605 = vmatprep.subr.bf16.mxu1 %v1770_v16  ;;  %v719_v16 = vmul.f32 0.044715, %v703_v14  ;;  %v723_v15 = vmul.f32 0.044715, %v707_v46 }
 0x5a5   :  { %v731_v2 = vadd.f32 %v715_v25, %v2337_v47  ;;  %v752_v23 = vmul.f32 0.7978846, %v736_v4 }
 0x5a6   :  { %v735_v43 = vadd.f32 %v719_v16, %v2342_v54  ;;  %v739_v61 = vadd.f32 %v723_v15, %v2363_v36 }
 0x5a7   :  { %1606 = vmatpush3.bf16.msra.mxu1 %v1771_v30  ;;  %v732_v30 = vadd.f32 %v716_v21, %v2332_v63  ;;  %v747_v14 = vmul.f32 0.7978846, %v731_v2  ;;  %v1773_v21 = vld [vmem:[%s2621_s7 + $0xb0] sm:$0xff]   ;;  %v425_v2 = vmul.f32 %v2192_v42, %v2089_v56 }
 0x5a8   :  { %v751_v29 = vmul.f32 0.7978846, %v735_v43  ;;  %1607 = vmatprep.subr.bf16.mxu1 %v1772_v59 }
 0x5a9   :  { %v748_v33 = vmul.f32 0.7978846, %v732_v30  ;;  %v1797_v17 = vpop.eup %1796 }
 0x5aa   :  { %v1799_v41 = vpop.eup %1798  ;;  %v778_v20 = vadd.f32 1.0, %v1797_v17 }
 0x5ab   :  { %1800 = vtanh.f32 %v748_v33  ;;  %1608 = vmatpush3.bf16.msra.mxu1 %v1773_v21 }
 0x5ac   :  { %1802 = vtanh.f32 %v747_v14 }
 0x5ad   :  { %1804 = vtanh.f32 %v751_v29 }
 0x5ae   :  { %1806 = vtanh.f32 %v752_v23 }
 0x5b5   :  { %v1801_v46 = vpop.eup %1800 }
 0x5b6   :  { %v780_v43 = vadd.f32 1.0, %v1801_v46 }
 0x5b8   :  { %v796_v15 = vmul.f32 0.5, %v780_v43 }
 0x5ed   :  { %v437_v22 = vpop.permute.xlu1 %436  ;;  %v435_v13 = vpop.permute.xlu0 %434 }
 0x5ee   :  { %vm443_vm12 = vcmp.ne.s32.totalorder %v437_v22, 0  ;;  %vm442_vm13 = vcmp.ne.s32.totalorder %v435_v13, 0  ;;  %v1774_v22 = vld [vmem:[%s2621_s7 + $0xf8] sm:$0xff]   ;;  %v755_v13 = vmul.f32 0.7978846, %v739_v61 }
 0x5ef   :  { %vm447_vm14 = vmand %vm302_vm3, %vm443_vm12  ;;  %1609 = vmatprep.subr.bf16.mxu1 %v1774_v22 }
 0x5f0   :  { %vm446_vm15 = vmand %vm301_vm2, %vm442_vm13  ;;  %v451_v11 = vsel %vm447_vm14, 1.0, %v1845_v62  ;;  %1610 = vmatpush3.bf16.msra.mxu1 %v1775_v12 }
 0x5f1   :  { %v450_v50 = vsel %vm446_vm15, 1.0, %v1845_v62  ;;  %v455_v25 = vmul.f32 %v451_v11, %v2081_v49 }
 0x5f2   :  { %v454_v40 = vmul.f32 %v450_v50, %v2077_v44  ;;  %v743_v44 = vadd.f32 %v727_v58, %v2358_v37  ;;  %v424_v58 = vmul.f32 %v2198_v45, %v2083_v52  ;;  %v812_v45 = vmul.f32 %v796_v15, %v2332_v63 }
 0x5f3   :  { %v690_v15 = vmul.f32 %v2047_v60, %v2047_v60 }
 0x5f4   :  { %900 = vperm.xlu1 %1703, %v454_v40   ;;  %v759_v30 = vmul.f32 0.7978846, %v743_v44  ;;  %v794_v40 = vmul.f32 0.5, %v778_v20 }
 0x5f5   :  { %v441_v10 = vpop.permute.xlu1 %440  ;;  %v439_v1 = vpop.permute.xlu0 %438 }
 0x5f6   :  { %vm444_vm2 = vcmp.ne.s32.totalorder %v439_v1, 0  ;;  %vm445_vm3 = vcmp.ne.s32.totalorder %v441_v10, 0  ;;  %1808 = vtanh.f32 %v759_v30 }
 0x5f7   :  { %vm448_vm1 = vmand %vm303_vm5, %vm444_vm2  ;;  %1810 = vtanh.f32 %v755_v13  ;;  %vm1463_vm5 = vcmask 113664  }
 0x5f8   :  { %905 = vperm.xlu1 %1703, %v455_v25   ;;  %v452_v16 = vsel %vm448_vm1, 1.0, %v1845_v62  ;;  %vm449_vm4 = vmand %vm304_vm6, %vm445_vm3 }
 0x5f9   :  { %v456_v49 = vmul.f32 %v452_v16, %v2083_v52  ;;  %v453_v35 = vsel %vm449_vm4, 1.0, %v1845_v62  ;;  %v782_v62 = vadd.f32 1.0, %v1799_v41  ;;  %v810_v52 = vmul.f32 %v794_v40, %v2323_v34 }
 0x5fa   :  { %v457_v31 = vmul.f32 %v453_v35, %v2089_v56 }
 0x5fb   :  { %910 = vperm.xlu0 %1705, %v456_v49   ;;  %v798_v42 = vmul.f32 0.5, %v782_v62 }
 0x5fc   :  { %1704 = vset.pattern.permute.xlu1 %v1844_v19  ;;  %v1803_v19 = vpop.eup %1802 }
 0x5fd   :  { %843 = vperm.xlu1 %1704, %v321_v53   ;;  %v1805_v33 = vpop.eup %1804  ;;  %v779_v59 = vadd.f32 1.0, %v1803_v19  ;;  %v814_v10 = vmul.f32 %v798_v42, %v2328_v18 }
 0x5fe   :  { %v1807_v50 = vpop.eup %1806  ;;  %v783_v11 = vadd.f32 1.0, %v1805_v33  ;;  %v490_v33 = vsub.s32 3, %v2021_v39 }
 0x5ff   :  { %1708 = vset.pattern.permute.xlu0 %v1852_v48  ;;  %v784_v14 = vadd.f32 1.0, %v1807_v50  ;;  %v795_v23 = vmul.f32 0.5, %v779_v59 }
 0x600   :  { %891 = vperm.xlu0 %1708, %v425_v2   ;;  %v1809_v21 = vpop.eup %1808  ;;  %v491_v50 = vrot.slane %v2038_v51, %v490_v33  ;;  %v694_v51 = vmul.f32 %v2053_v0, %v2053_v0 }
 0x601   :  { %1706 = vset.pattern.permute.xlu1 %v1853_v55  ;;  %v1811_v29 = vpop.eup %1810  ;;  %v800_v44 = vmul.f32 0.5, %v784_v14  ;;  %v791_v25 = vadd.f32 1.0, %v1809_v21  ;;  %v811_v22 = vmul.f32 %v795_v23, %v2337_v47  ;;  %v706_v14 = vmul.f32 %v690_v15, %v2047_v60 }
 0x602   :  { %915 = vperm.xlu1 %1706, %v457_v31   ;;  %v787_v18 = vadd.f32 1.0, %v1811_v29  ;;  %v710_v21 = vmul.f32 %v694_v51, %v2053_v0 }
 0x603   :  { %v816_v63 = vmul.f32 %v800_v44, %v2348_v57  ;;  %v807_v12 = vmul.f32 0.5, %v791_v25 }
 0x604   :  { %1709 = vset.pattern.permute.xlu0 %v1853_v55  ;;  %v803_v17 = vmul.f32 0.5, %v787_v18  ;;  %v726_v44 = vmul.f32 0.044715, %v710_v21 }
 0x605   :  { %v823_v57 = vmul.f32 %v807_v12, %v2358_v37  ;;  %v2466_v37 = vadd.f32 %v2059_v3, %v491_v50  ;;  %v2482_v3 = vadd.f32 %v2067_v7, %v491_v50 }
 0x606   :  { %1707 = vset.pattern.permute.xlu1 %v1852_v48  ;;  %v2425_v56 = vpop.permute.xlu1 %857  ;;  %v2427_v4 = vpop.permute.xlu0 %833  ;;  %v799_v48 = vmul.f32 0.5, %v783_v11  ;;  %v819_v31 = vmul.f32 %v803_v17, %v2363_v36 }
 0x607   :  { %886 = vperm.xlu1 %1707, %v424_v58   ;;  %v847_v61 = vmul.f32 %v2427_v4, %v814_v10  ;;  %v2469_v58 = vadd.f32 %v2063_v5, %v491_v50  ;;  %v685_v36 = vmul.f32 %v2466_v37, %v2466_v37  ;;  %v2485_v5 = vadd.f32 %v2071_v9, %v491_v50 }
 0x608   :  { %v815_v34 = vmul.f32 %v799_v48, %v2342_v54  ;;  %v693_v29 = vmul.f32 %v2482_v3, %v2482_v3  ;;  %v2493_v10 = vadd.f32 %v2069_v8, %v2319_v32  ;;  %v2500_v9 = vadd.f32 %v2065_v6, %v2319_v32 }
 0x609   :  { %v689_v42 = vmul.f32 %v2469_v58, %v2469_v58  ;;  %v701_v40 = vmul.f32 %v685_v36, %v2466_v37  ;;  %v697_v7 = vmul.f32 %v2485_v5, %v2485_v5  ;;  %v742_v6 = vadd.f32 %v726_v44, %v2053_v0 }
 0x60a   :  { %v871_v35 = vmul.f32 %v2425_v56, %v815_v34  ;;  %v709_v23 = vmul.f32 %v693_v29, %v2482_v3  ;;  %v696_v25 = vmul.f32 %v2493_v10, %v2493_v10 }
 0x60b   :  { %v2432_v55 = vpop.permute.xlu1 %828  ;;  %v2434_v1 = vpop.permute.xlu0 %876  ;;  %v705_v39 = vmul.f32 %v689_v42, %v2469_v58  ;;  %v717_v11 = vmul.f32 0.044715, %v701_v40  ;;  %v713_v8 = vmul.f32 %v697_v7, %v2485_v5  ;;  %v758_v17 = vmul.f32 0.7978846, %v742_v6 }
 0x60c   :  { %v846_v16 = vmul.f32 %v2432_v55, %v810_v52  ;;  %v2439_v30 = vmul.f32 %v2434_v1, %v812_v45  ;;  %v722_v45 = vmul.f32 0.044715, %v706_v14  ;;  %v725_v32 = vmul.f32 0.044715, %v709_v23 }
 0x60d   :  { %v721_v59 = vmul.f32 0.044715, %v705_v39  ;;  %v733_v52 = vadd.f32 %v717_v11, %v2466_v37  ;;  %v712_v34 = vmul.f32 %v696_v25, %v2493_v10 }
 0x60e   :  { %v922_v49 = vpack.c.bf16 %v847_v61, %v846_v16  ;;  %v692_v16 = vmul.f32 %v2500_v9, %v2500_v9  ;;  %v738_v18 = vadd.f32 %v722_v45, %v2047_v60 }
 0x60f   :  { %v737_v48 = vadd.f32 %v721_v59, %v2469_v58  ;;  %v749_v61 = vmul.f32 0.7978846, %v733_v52 }
 0x610   :  { %v2444_v13 = vpop.permute.xlu1 %881  ;;  %v2446_v53 = vpop.permute.xlu0 %852  ;;  %v754_v12 = vmul.f32 0.7978846, %v738_v18 }
 0x611   :  { %v2450_v41 = vmul.f32 %v2444_v13, %v816_v63  ;;  %v870_v46 = vmul.f32 %v2446_v53, %v811_v22  ;;  %v729_v63 = vmul.f32 0.044715, %v713_v8  ;;  %v708_v22 = vmul.f32 %v692_v16, %v2500_v9 }
 0x612   :  { %1812 = vtanh.f32 %v749_v61 }
 0x613   :  { %v924_v54 = vpack.c.bf16 %v2450_v41, %v2439_v30  ;;  %v923_v2 = vpack.c.bf16 %v871_v35, %v870_v46  ;;  %v741_v35 = vadd.f32 %v725_v32, %v2482_v3  ;;  %v728_v46 = vmul.f32 0.044715, %v712_v34 }
 0x614   :  { %v2456_v47 = vpop.permute.xlu0 %867 }
 0x615   :  { %v873_v19 = vmul.f32 %v2456_v47, %v823_v57  ;;  %v2460_v62 = vpop.permute.xlu1 %862  ;;  %1227 = vmatprep.mubr.bf16.mxu0 %v923_v2  ;;  %v745_v2 = vadd.f32 %v729_v63, %v2485_v5  ;;  %v724_v57 = vmul.f32 0.044715, %v708_v22 }
 0x616   :  { %v872_v20 = vmul.f32 %v2460_v62, %v819_v31  ;;  %1228 = vmatmul.mubr.bf16.vlgmr.msra.gmra.mrb[12].mxu0 %v922_v49  ;;  %v753_v49 = vmul.f32 0.7978846, %v737_v48  ;;  %v757_v31 = vmul.f32 0.7978846, %v741_v35 }
 0x618   :  { %v927_v43 = vpack.c.bf16 %v873_v19, %v872_v20  ;;  %1814 = vtanh.f32 %v753_v49  ;;  %v744_v19 = vadd.f32 %v728_v46, %v2493_v10  ;;  %v761_v20 = vmul.f32 0.7978846, %v745_v2 }
 0x619   :  { %1816 = vtanh.f32 %v754_v12 }
 0x61a   :  { %1235 = vmatprep.mubr.bf16.mxu0 %v927_v43  ;;  %1818 = vtanh.f32 %v758_v17  ;;  %v740_v43 = vadd.f32 %v724_v57, %v2500_v9  ;;  %v760_v36 = vmul.f32 0.7978846, %v744_v19  ;;  %v2517_v51 = vpop.permute.xlu1 %838 }
 0x61b   :  { %1820 = vtanh.f32 %v757_v31 }
 0x61c   :  { %v1813_v33 = vpop.eup %1812  ;;  %1822 = vtanh.f32 %v761_v20  ;;  %v756_v42 = vmul.f32 0.7978846, %v740_v43 }
 0x61d   :  { %v781_v40 = vadd.f32 1.0, %v1813_v33  ;;  %1824 = vtanh.f32 %v760_v36 }
 0x61e   :  { %1826 = vtanh.f32 %v756_v42 }
 0x61f   :  { %v797_v14 = vmul.f32 0.5, %v781_v40 }
 0x621   :  { %v813_v48 = vmul.f32 %v797_v14, %v2466_v37 }
 0x622   :  { %v1815_v50 = vpop.eup %1814 }
 0x623   :  { %v785_v15 = vadd.f32 1.0, %v1815_v50  ;;  %v1817_v39 = vpop.eup %1816 }
 0x624   :  { %v1819_v11 = vpop.eup %1818  ;;  %v786_v21 = vadd.f32 1.0, %v1817_v39  ;;  %v1508_v39 = vld [vmem:[%s2623_s8] ss:$0 sm:$0xff] }
 0x625   :  { %v801_v59 = vmul.f32 0.5, %v785_v15  ;;  %v790_v7 = vadd.f32 1.0, %v1819_v11  ;;  %v1821_v52 = vpop.eup %1820  ;;  %v1776_v15 = vld [vmem:[%s2622_s9] sm:$0xff]   ;;  %v999_v14 = vmul.f32 %v1508_v39, %v2432_v55 }
 0x626   :  { %v1823_v45 = vpop.eup %1822  ;;  %v802_v23 = vmul.f32 0.5, %v786_v21  ;;  %v789_v18 = vadd.f32 1.0, %v1821_v52  ;;  %1653 = vmatprep.subr.bf16.mxu0 %v1776_v15  ;;  %v1778_v52 = vld [vmem:[%s2622_s9 + $0x10] sm:$0xff]  }
 0x627   :  { %v817_v44 = vmul.f32 %v801_v59, %v2469_v58  ;;  %v806_v8 = vmul.f32 0.5, %v790_v7  ;;  %v793_v49 = vadd.f32 1.0, %v1823_v45  ;;  %v1825_v6 = vpop.eup %1824  ;;  %1654 = vmatpush3.bf16.msra.mxu0 %v1776_v15  ;;  %v1000_v45 = vmul.f32 %v1508_v39, %v2427_v4  ;;  %v1542_v4 = vld [vmem:[%s2623_s8 + $0x2] ss:$0 sm:$0xff] }
 0x628   :  { %v1827_v32 = vpop.eup %1826  ;;  %v818_v63 = vmul.f32 %v802_v23, %v2047_v60  ;;  %v805_v37 = vmul.f32 0.5, %v789_v18  ;;  %v792_v46 = vadd.f32 1.0, %v1825_v6  ;;  %v1779_v23 = vld [vmem:[%s2622_s9 + $0x18] sm:$0xff]  }
 0x629   :  { %v822_v22 = vmul.f32 %v806_v8, %v2053_v0  ;;  %v809_v12 = vmul.f32 0.5, %v793_v49  ;;  %v788_v2 = vadd.f32 1.0, %v1827_v32 }
 0x62a   :  { %v848_v17 = vmul.f32 %v2517_v51, %v818_v63  ;;  %v821_v0 = vmul.f32 %v805_v37, %v2482_v3  ;;  %v808_v19 = vmul.f32 0.5, %v792_v46 }
 0x62b   :  { %v825_v31 = vmul.f32 %v809_v12, %v2485_v5  ;;  %v804_v43 = vmul.f32 0.5, %v788_v2 }
 0x62d   :  { %v820_v36 = vmul.f32 %v804_v43, %v2500_v9 }
 0x673   :  { %v2519_v29 = vpop.permute.xlu1 %900 }
 0x674   :  { %v918_v61 = vmul.f32 %v2519_v29, %v813_v48 }
 0x677   :  { %v2523_v25 = vpop.permute.xlu1 %905 }
 0x678   :  { %v919_v16 = vmul.f32 %v2523_v25, %v817_v44 }
 0x67a   :  { %v925_v34 = vpack.c.bf16 %v919_v16, %v918_v61  ;;  %v2536_v57 = vpop.permute.xlu0 %910  ;;  %v1541_v16 = vld [vmem:[%s2623_s8 + $0x1] ss:$0 sm:$0xff] }
 0x67b   :  { %v920_v33 = vmul.f32 %v2536_v57, %v821_v0  ;;  %v1298_v32 = vmul.f32 %v1541_v16, %v2446_v53  ;;  %v1299_v12 = vmul.f32 %v1541_v16, %v2425_v56 }
 0x67c   :  { %1276 = vmatprep.mubr.bf16.mxu1 %v925_v34  ;;  %v2529_v58 = vpop.permute.xlu1 %843  ;;  %v1543_v34 = vld [vmem:[%s2623_s8 + $0x3] ss:$0 sm:$0xff] }
 0x67d   :  { %v849_v35 = vmul.f32 %v2529_v58, %v822_v22  ;;  %1277 = vmatmul.mubr.bf16.vlgmr.msra.gmra.mrb[12].mxu1 %v924_v54  ;;  %v824_v54 = vmul.f32 %v808_v19, %v2493_v10  ;;  %v1777_v10 = vld [vmem:[%s2622_s9 + $0x8] sm:$0xff]   ;;  %v1324_v53 = vmul.f32 %v1543_v34, %v2519_v29  ;;  %v1002_v43 = vmul.f32 %v1508_v39, %v2529_v58 }
 0x67e   :  { %1655 = vmatprep.subr.bf16.mxu0 %v1777_v10 }
 0x67f   :  { %v926_v60 = vpack.c.bf16 %v849_v35, %v848_v17  ;;  %v2544_v30 = vpop.permute.xlu0 %891  ;;  %1656 = vmatpush3.bf16.msra.mxu0 %v1777_v10  ;;  %v1311_v35 = vmul.f32 %v1542_v4, %v2434_v1 }
 0x680   :  { %v897_v3 = vmul.f32 %v2544_v30, %v824_v54  ;;  %1657 = vmatprep.subr.bf16.mxu0 %v1778_v52  ;;  %v1325_v54 = vmul.f32 %v1543_v34, %v2523_v25 }
 0x681   :  { %v2540_v20 = vpop.permute.xlu1 %915  ;;  %1236 = vmatmul.mubr.bf16.gmra.mrb[16].mxu0 %v926_v60 }
 0x682   :  { %v921_v50 = vmul.f32 %v2540_v20, %v825_v31  ;;  %v1312_v31 = vmul.f32 %v1542_v4, %v2444_v13 }
 0x683   :  { %1658 = vmatpush3.bf16.msra.mxu0 %v1778_v52  ;;  %v1314_v52 = vmul.f32 %v1542_v4, %v2544_v30 }
 0x684   :  { %v929_v41 = vpack.c.bf16 %v921_v50, %v920_v33  ;;  %1659 = vmatprep.subr.bf16.mxu0 %v1779_v23 }
 0x686   :  { %v2548_v42 = vpop.permute.xlu1 %886  ;;  %1284 = vmatprep.mubr.bf16.mxu1 %v929_v41 }
 0x687   :  { %v896_v5 = vmul.f32 %v2548_v42, %v820_v36  ;;  %1660 = vmatpush3.bf16.msra.mxu0 %v1779_v23 }
 0x689   :  { %v928_v40 = vpack.c.bf16 %v897_v3, %v896_v5  ;;  %v1001_v5 = vmul.f32 %v1508_v39, %v2517_v51  ;;  %v1313_v51 = vmul.f32 %v1542_v4, %v2548_v42 }
 0x68b   :  { %1285 = vmatmul.mubr.bf16.gmra.mrb[16].mxu1 %v928_v40 }
 0x6e9   :  { %v1583_v9 = vpop.f32.mrb[12].mxu0 }
 0x6ea   :  { %v1584_v11 = vpop.f32.mrb[13].mxu0 }
 0x6eb   :  { %v1585_v59 = vadd.f32 %v1584_v11, %v1583_v9  ;;  %v1586_v21 = vpop.f32.mrb[14].mxu0 }
 0x6ec   :  { %v1587_v7 = vpop.f32.mrb[15].mxu0 }
 0x6ed   :  { %v1230_v48 = vadd.f32 %v1585_v59, %v999_v14  ;;  %v1588_v44 = vadd.f32 %v1587_v7, %v1586_v21  ;;  %v1300_v59 = vmul.f32 %v1541_v16, %v2460_v62  ;;  %v1301_v7 = vmul.f32 %v1541_v16, %v2456_v47 }
 0x6ef   :  { %v1233_v8 = vadd.f32 %v1588_v44, %v1000_v45  ;;  %v1327_v44 = vmul.f32 %v1543_v34, %v2540_v20 }
 0x750   :  { %v1611_v55 = vpop.f32.mrb[12].mxu1 }
 0x751   :  { %v1612_v61 = vpop.f32.mrb[13].mxu1 }
 0x752   :  { %v1613_v18 = vadd.f32 %v1612_v61, %v1611_v55  ;;  %v1614_v49 = vpop.f32.mrb[14].mxu1 }
 0x753   :  { %v1615_v6 = vpop.f32.mrb[15].mxu1 }
 0x754   :  { %v1279_v63 = vadd.f32 %v1613_v18, %v1230_v48  ;;  %v1616_v22 = vadd.f32 %v1615_v6, %v1614_v49  ;;  %v1589_v37 = vpop.f32.mrb[16].mxu0 }
 0x755   :  { %v1590_v17 = vpop.f32.mrb[17].mxu0 }
 0x756   :  { %v1302_v46 = vadd.f32 %v1298_v32, %v1279_v63  ;;  %v1282_v2 = vadd.f32 %v1616_v22, %v1233_v8  ;;  %v1591_v60 = vadd.f32 %v1590_v17, %v1589_v37  ;;  %v1592_v0 = vpop.f32.mrb[18].mxu0 }
 0x757   :  { %v1593_v19 = vpop.f32.mrb[19].mxu0 }
 0x758   :  { %v1315_v33 = vadd.f32 %v1311_v35, %v1302_v46  ;;  %v1303_v50 = vadd.f32 %v1299_v12, %v1282_v2  ;;  %v1594_v41 = vadd.f32 %v1593_v19, %v1592_v0  ;;  %v1238_v10 = vadd.f32 %v1591_v60, %v1001_v5 }
 0x759   :  { %v1433_v60 = vand.u32 127, %v476_v38 }
 0x75a   :  { %v1328_v56 = vadd.f32 %v1324_v53, %v1315_v33  ;;  %v1316_v36 = vadd.f32 %v1312_v31, %v1303_v50  ;;  %v1241_v3 = vadd.f32 %v1594_v41, %v1002_v43 }
 0x75c   :  { %v1329_v1 = vadd.f32 %v1325_v54, %v1316_v36  ;;  %v1332_v15 = vadd.f32 %v1328_v56, %v1980_v26 }
 0x75e   :  { %v1617_v40 = vpop.f32.mrb[16].mxu1  ;;  %v1333_v13 = vadd.f32 %v1329_v1, %v1982_v27  ;;  %v1326_v27 = vmul.f32 %v1543_v34, %v2536_v57  ;;  %v1544_v57 = vld [vmem:[%s2624_s10] ss:$0 sm:$0xff] }
 0x75f   :  { %v1618_v29 = vpop.f32.mrb[17].mxu1 }
 0x760   :  { %v1619_v9 = vadd.f32 %v1618_v29, %v1617_v40  ;;  %v1620_v58 = vpop.f32.mrb[18].mxu1  ;;  %v1336_v11 = vpack.c.bf16 %v1333_v13, %v1332_v15 }
 0x761   :  { %v1621_v14 = vpop.f32.mrb[19].mxu1 }
 0x762   :  { %v1287_v25 = vadd.f32 %v1619_v9, %v1238_v10  ;;  %v1622_v21 = vadd.f32 %v1621_v14, %v1620_v58  ;;  %1661 = vmatprep.mubr.msk.bf16.mxu0 %vm92_vm0, %v1336_v11 }
 0x764   :  { %v1304_v39 = vadd.f32 %v1300_v59, %v1287_v25  ;;  %v1290_v26 = vadd.f32 %v1622_v21, %v1241_v3 }
 0x766   :  { %v1317_v45 = vadd.f32 %v1313_v51, %v1304_v39  ;;  %v1305_v48 = vadd.f32 %v1301_v7, %v1290_v26 }
 0x768   :  { %v1330_v23 = vadd.f32 %v1326_v27, %v1317_v45  ;;  %v1318_v62 = vadd.f32 %v1314_v52, %v1305_v48 }
 0x76a   :  { %v1331_v8 = vadd.f32 %v1327_v44, %v1318_v62  ;;  %v1334_v55 = vadd.f32 %v1330_v23, %v1984_v28 }
 0x76c   :  { %v1335_v61 = vadd.f32 %v1331_v8, %v1978_v24 }
 0x76e   :  { %v1337_v47 = vpack.c.bf16 %v1335_v61, %v1334_v55 }
 0x770   :  { %1662 = vmatmul.mubr.msk.bf16.vlgmr.msra.gmra.mrb[20].mxu0 %vm92_vm0, %v1337_v47  ;;  %vm1434_vm0 = vcmp.lt.s32.totalorder %v1433_v60, 8 }
 0x843   :  { %v1663_v42 = vpop.f32.mrb[20].mxu0 }
 0x844   :  { %v1426_v30 = vadd.f32 %v1663_v42, %v1544_v57  ;;  %v1417_v16 = vpop.f32.mrb[21].mxu0 }
 0x845   :  { %v1418_v18 = vadd.f32 %v1544_v57, %v1417_v16  ;;  %v1664_v49 = vpop.f32.mrb[22].mxu0 }
 0x846   :  { %v1553_v20 = vmul.f32 -1.442695, %v1426_v30  ;;  %v1429_v4 = vadd.f32 %v1664_v49, %v1544_v57  ;;  %v1420_v6 = vpop.f32.mrb[23].mxu0 }
 0x847   :  { %v1551_v32 = vmul.f32 -1.442695, %v1418_v18  ;;  %v1421_v34 = vadd.f32 %v1544_v57, %v1420_v6 }
 0x848   :  { %1828 = vpow2.f32 %v1553_v20  ;;  %v1554_v28 = vmul.f32 -1.442695, %v1429_v4 }
 0x849   :  { %1830 = vpow2.f32 %v1551_v32  ;;  %v1552_v24 = vmul.f32 -1.442695, %v1421_v34 }
 0x84a   :  { %1832 = vpow2.f32 %v1554_v28 }
 0x84b   :  { %1834 = vpow2.f32 %v1552_v24 }
 0x852   :  { %v1829_v63 = vpop.eup %1828 }
 0x853   :  { %v1831_v22 = vpop.eup %1830  ;;  %v1449_v37 = vadd.f32 1.0, %v1829_v63 }
 0x854   :  { %v1833_v12 = vpop.eup %1832  ;;  %v1447_v17 = vadd.f32 1.0, %v1831_v22 }
 0x855   :  { %v1835_v35 = vpop.eup %1834  ;;  %1836 = vrcp.f32 %v1449_v37  ;;  %v1450_v46 = vadd.f32 1.0, %v1833_v12 }
 0x856   :  { %1838 = vrcp.f32 %v1447_v17  ;;  %v1448_v2 = vadd.f32 1.0, %v1835_v35 }
 0x857   :  { %1840 = vrcp.f32 %v1450_v46 }
 0x858   :  { %1842 = vrcp.f32 %v1448_v2 }
 0x85f   :  { %v1837_v0 = vpop.eup %1836 }
 0x860   :  { %v1839_v31 = vpop.eup %1838  ;;  %v1461_v53 = vsel %vm1434_vm0, %v1426_v30, %v1837_v0 }
 0x861   :  { %v1841_v19 = vpop.eup %1840  ;;  %1466 = vst.msk [vmem:[%s2625_s11 + $0x10] sm:$0xff] %vm1463_vm5, %v1461_v53  ;;  %v1459_v43 = vsel %vm1434_vm0, %v1418_v18, %v1839_v31 }
 0x862   :  { %v1843_v33 = vpop.eup %1842  ;;  %1464 = vst.msk [vmem:[%s2625_s11] sm:$0xff] %vm1463_vm5, %v1459_v43  ;;  %v1462_v50 = vsel %vm1434_vm0, %v1429_v4, %v1841_v19 }
 0x863   :  { %1467 = vst.msk [vmem:[%s2625_s11 + $0x18] sm:$0xff] %vm1463_vm5, %v1462_v50  ;;  %v1460_v38 = vsel %vm1434_vm0, %v1421_v34, %v1843_v33 }
 0x864   :  { %1465 = vst.msk [vmem:[%s2625_s11 + $0x8] sm:$0xff] %vm1463_vm5, %v1460_v38 }

</bundles_post_ra>
